<compile_context>
chip_gen: v5e
topology: v5e:2x2
jax: 0.10.0
libtpu: 0.0.40
codegen_flags: <defaults>
</compile_context>

<pallas_src>
import numpy as np

import jax
import jax.numpy as jnp
from jax.experimental import pallas as pl
from jax.experimental.pallas import tpu as pltpu

# ---------------- model constants ----------------
CONV1_IN_CHANNELS = 4
CONV1_OUT_CHANNELS = 8
CONV1_KERNEL_SIZE = 3
CONV1_STRIDE = 2

CONV2_OUT_CHANNELS = 16
CONV2_KERNEL_SIZE = 3
CONV2_STRIDE = 2

CONV3_OUT_CHANNELS = 16
CONV3_KERNEL_SIZE = 3
CONV3_STRIDE = 1

IN_H = IN_W = 16
OH1 = (IN_H - CONV1_KERNEL_SIZE) // CONV1_STRIDE + 1   # 7
OW1 = (IN_W - CONV1_KERNEL_SIZE) // CONV1_STRIDE + 1   # 7
OH2 = (OH1 - CONV2_KERNEL_SIZE) // CONV2_STRIDE + 1    # 3
OW2 = (OW1 - CONV2_KERNEL_SIZE) // CONV2_STRIDE + 1    # 3
OH3 = (OH2 - CONV3_KERNEL_SIZE) // CONV3_STRIDE + 1    # 1
OW3 = (OW2 - CONV3_KERNEL_SIZE) // CONV3_STRIDE + 1    # 1

N_POS1 = OH1 * OW1                                      # 49
N_POS2 = OH2 * OW2                                      # 9

FC1_UNITS_IN = CONV3_OUT_CHANNELS * OH3 * OW3           # 16
FC1_UNITS_OUT = 32
ACTION_SIZE = 6

K0 = CONV1_IN_CHANNELS * IN_H * IN_W                    # 1024 (flattened input)
OUT_PAD = 128                                           # lane-dense output width

BATCH_ALIGN = 16                                        # bf16 sublane packing
MAX_BATCH_TILE = 512                                    # amortizes per-step overhead,
                                                        # keeps >=2 steps up to B=1024


def _round_up(x, m):
    return ((x + m - 1) // m) * m


def _pick_batch_tile(B):
    """Batch tile: multiple of 16, <= 512 rows, and >= 2 grid steps whenever
    B > 16 so both v7x TensorCores are used (grid axis is 'parallel')."""
    if B <= BATCH_ALIGN:
        return BATCH_ALIGN
    return min(MAX_BATCH_TILE, _round_up((B + 1) // 2, BATCH_ALIGN))


# ---------------- Pallas kernel: whole forward pass, fused ----------------
def fused_cnn_kernel(x_ref, w1_ref, b1_ref, w2_ref, b2_ref, w3_ref, b3_ref,
                     w4_ref, b4_ref, w5_ref, b5_ref, o_ref):
    f32 = jnp.float32
    bf16 = jnp.bfloat16

    # conv1 (conv-as-GEMM against the sparse conv matrix) + bias + relu
    h = jnp.dot(x_ref[...], w1_ref[...], preferred_element_type=f32)       # [TB, 392]
    h = jnp.maximum(h + b1_ref[...], 0.0)

    # conv2 (folded GEMM on conv1's position-major / channel-minor lanes)
    h = jnp.dot(h.astype(bf16), w2_ref[...], preferred_element_type=f32)   # [TB, 144]
    h = jnp.maximum(h + b2_ref[...], 0.0)

    # conv3 (full 3x3 receptive field -> plain GEMM) + bias + relu
    h = jnp.dot(h.astype(bf16), w3_ref[...], preferred_element_type=f32)   # [TB, 16]
    h = jnp.maximum(h + b3_ref[...], 0.0)

    # fc1 + relu
    h = jnp.dot(h.astype(bf16), w4_ref[...], preferred_element_type=f32)   # [TB, 32]
    h = jnp.maximum(h + b4_ref[...], 0.0)

    # fc2 (no relu), lane-dense zero-padded to 128, stored bf16
    h = jnp.dot(h.astype(bf16), w5_ref[...], preferred_element_type=f32)   # [TB, 128]
    o_ref[...] = (h + b5_ref[...]).astype(o_ref.dtype)


# ---------------- one-time weight preparation (hoisted out of the hot path) ----------------
def _build_conv1_gemm(w):
    """conv1 weights [8,4,3,3] -> sparse conv-as-GEMM matrix [C*H*W, 49*8]."""
    w = np.asarray(w)
    mat = np.zeros((K0, N_POS1 * CONV1_OUT_CHANNELS), np.float32)
    for y1 in range(OH1):
        for x1 in range(OW1):
            p1 = y1 * OW1 + x1
            for o in range(CONV1_OUT_CHANNELS):
                col = p1 * CONV1_OUT_CHANNELS + o
                for c in range(CONV1_IN_CHANNELS):
                    for kh in range(CONV1_KERNEL_SIZE):
                        for kw in range(CONV1_KERNEL_SIZE):
                            yy = CONV1_STRIDE * y1 + kh
                            xx = CONV1_STRIDE * x1 + kw
                            row = c * IN_H * IN_W + yy * IN_W + xx
                            mat[row, col] = w[o, c, kh, kw]
    return mat


def _build_conv2_gemm(w):
    """conv2 weights [16,8,3,3] -> folded GEMM matrix [49*8, 9*16] acting on
    conv1's lane layout (position-major, channel-minor)."""
    w = np.asarray(w)
    mat = np.zeros((N_POS1 * CONV1_OUT_CHANNELS, N_POS2 * CONV2_OUT_CHANNELS),
                   np.float32)
    for y2 in range(OH2):
        for x2 in range(OW2):
            p2 = y2 * OW2 + x2
            for a in range(CONV2_KERNEL_SIZE):
                for b in range(CONV2_KERNEL_SIZE):
                    p1 = (CONV2_STRIDE * y2 + a) * OW1 + (CONV2_STRIDE * x2 + b)
                    for o in range(CONV2_OUT_CHANNELS):
                        for c in range(CONV1_OUT_CHANNELS):
                            mat[p1 * CONV1_OUT_CHANNELS + c,
                                p2 * CONV2_OUT_CHANNELS + o] = w[o, c, a, b]
    return mat


def prepare_params(p):
    """One-time host-side prep: five GEMM weight matrices (bf16) + biases (f32)."""
    prep = {}
    prep["w1"] = jnp.asarray(_build_conv1_gemm(p["conv1_w"]), jnp.bfloat16)          # [1024, 392]
    prep["b1"] = jnp.tile(p["conv1_b"], N_POS1).reshape(1, -1).astype(jnp.float32)   # [1, 392]

    prep["w2"] = jnp.asarray(_build_conv2_gemm(p["conv2_w"]), jnp.bfloat16)          # [392, 144]
    prep["b2"] = jnp.tile(p["conv2_b"], N_POS2).reshape(1, -1).astype(jnp.float32)   # [1, 144]

    # conv3: input = full 3x3 map of conv2 outputs (lane order p2*16+c) -> [144, 16]
    w3 = np.asarray(p["conv3_w"]).transpose(2, 3, 1, 0).reshape(
        N_POS2 * CONV2_OUT_CHANNELS, CONV3_OUT_CHANNELS)
    prep["w3"] = jnp.asarray(w3, jnp.bfloat16)
    prep["b3"] = p["conv3_b"].reshape(1, -1).astype(jnp.float32)

    prep["w4"] = p["fc1_w"].T.astype(jnp.bfloat16)                                   # [16, 32]
    prep["b4"] = p["fc1_b"].reshape(1, -1).astype(jnp.float32)

    w5 = np.zeros((FC1_UNITS_OUT, OUT_PAD), np.float32)
    w5[:, :ACTION_SIZE] = np.asarray(p["fc2_w"]).T
    prep["w5"] = jnp.asarray(w5, jnp.bfloat16)                                       # [32, 128]
    b5 = np.zeros((1, OUT_PAD), np.float32)
    b5[0, :ACTION_SIZE] = np.asarray(p["fc2_b"])
    prep["b5"] = jnp.asarray(b5)
    return prep


# ---------------- forward (single pallas_call) ----------------
def cnn_forward(prep, x):
    B = x.shape[0]

    # The kernel consumes a flat [B, C*H*W] bf16 slab.  NCHW->flat is
    # layout-trivial; the bf16 cast halves the dominant HBM read inside the
    # kernel.  In a real pipeline the upstream producer should emit bf16
    # directly (fusing this cast away); for an isolated f32 input it is a
    # single fused XLA convert.
    x2d = x.reshape(B, K0)
    if x2d.dtype != jnp.bfloat16:
        x2d = x2d.astype(jnp.bfloat16)

    TB = _pick_batch_tile(B)
    rows = B
    if B < TB:
        # Tiny batches only: pad up to a single 16-row tile (negligible cost).
        # Larger batches are NOT padded -- the grid uses a masked partial last
        # block, avoiding a full extra HBM read+write of the activations.
        x2d = jnp.pad(x2d, ((0, TB - B), (0, 0)))
        rows = TB

    w1, b1 = prep["w1"], prep["b1"]
    w2, b2 = prep["w2"], prep["b2"]
    w3, b3 = prep["w3"], prep["b3"]
    w4, b4 = prep["w4"], prep["b4"]
    w5, b5 = prep["w5"], prep["b5"]

    out = pl.pallas_call(
        fused_cnn_kernel,
        out_shape=jax.ShapeDtypeStruct((rows, OUT_PAD), jnp.bfloat16),
        grid=(pl.cdiv(rows, TB),),
        in_specs=[
            pl.BlockSpec((TB, K0), lambda i: (i, 0)),      # activations: batch-tiled
            pl.BlockSpec(w1.shape, lambda i: (0, 0)),      # weights/biases: VMEM-resident
            pl.BlockSpec(b1.shape, lambda i: (0, 0)),
            pl.BlockSpec(w2.shape, lambda i: (0, 0)),
            pl.BlockSpec(b2.shape, lambda i: (0, 0)),
            pl.BlockSpec(w3.shape, lambda i: (0, 0)),
            pl.BlockSpec(b3.shape, lambda i: (0, 0)),
            pl.BlockSpec(w4.shape, lambda i: (0, 0)),
            pl.BlockSpec(b4.shape, lambda i: (0, 0)),
            pl.BlockSpec(w5.shape, lambda i: (0, 0)),
            pl.BlockSpec(b5.shape, lambda i: (0, 0)),
        ],
        out_specs=pl.BlockSpec((TB, OUT_PAD), lambda i: (i, 0)),
        compiler_params=pltpu.CompilerParams(
            dimension_semantics=("parallel",),
            vmem_limit_bytes=32 * 1024 * 1024),
    )(x2d, w1, b1, w2, b2, w3, b3, w4, b4, w5, b5)

    # Only ACTION_SIZE of the 128 padded lanes are real (w5/b5 zero-padding makes
    # the rest exact zeros); drop padded lanes/rows and hand back f32.
    return out[:B, :ACTION_SIZE].astype(jnp.float32)


# ---------------- parameter init (deterministic, PyTorch-style bounds) ----------------
def init_params(key):
    ks = jax.random.split(key, 10)

    def u(k, shape, fan_in):
        bound = 1.0 / jnp.sqrt(fan_in)
        return jax.random.uniform(k, shape, jnp.float32, -bound, bound)

    p = {}
    fan1 = CONV1_IN_CHANNELS * CONV1_KERNEL_SIZE * CONV1_KERNEL_SIZE
    p["conv1_w"] = u(ks[0], (CONV1_OUT_CHANNELS, CONV1_IN_CHANNELS,
                             CONV1_KERNEL_SIZE, CONV1_KERNEL_SIZE), fan1)
    p["conv1_b"] = u(ks[1], (CONV1_OUT_CHANNELS,), fan1)

    fan2 = CONV1_OUT_CHANNELS * CONV2_KERNEL_SIZE * CONV2_KERNEL_SIZE
    p["conv2_w"] = u(ks[2], (CONV2_OUT_CHANNELS, CONV1_OUT_CHANNELS,
                             CONV2_KERNEL_SIZE, CONV2_KERNEL_SIZE), fan2)
    p["conv2_b"] = u(ks[3], (CONV2_OUT_CHANNELS,), fan2)

    fan3 = CONV2_OUT_CHANNELS * CONV3_KERNEL_SIZE * CONV3_KERNEL_SIZE
    p["conv3_w"] = u(ks[4], (CONV3_OUT_CHANNELS, CONV2_OUT_CHANNELS,
                             CONV3_KERNEL_SIZE, CONV3_KERNEL_SIZE), fan3)
    p["conv3_b"] = u(ks[5], (CONV3_OUT_CHANNELS,), fan3)

    p["fc1_w"] = u(ks[6], (FC1_UNITS_OUT, FC1_UNITS_IN), FC1_UNITS_IN)
    p["fc1_b"] = u(ks[7], (FC1_UNITS_OUT,), FC1_UNITS_IN)

    p["fc2_w"] = u(ks[8], (ACTION_SIZE, FC1_UNITS_OUT), FC1_UNITS_OUT)
    p["fc2_b"] = u(ks[9], (ACTION_SIZE,), FC1_UNITS_OUT)
    return p


# ---------------- pure-JAX reference (for correctness check only) ----------------
def reference_forward(params, x):
    hp = jax.lax.Precision.HIGHEST

    def conv(x, w, b, s):
        y = jax.lax.conv_general_dilated(
            x, w, window_strides=(s, s), padding="VALID",
            dimension_numbers=("NCHW", "OIHW", "NCHW"), precision=hp)
        return jax.nn.relu(y + b[None, :, None, None])

    x = conv(x, params["conv1_w"], params["conv1_b"], CONV1_STRIDE)
    x = conv(x, params["conv2_w"], params["conv2_b"], CONV2_STRIDE)
    x = conv(x, params["conv3_w"], params["conv3_b"], CONV3_STRIDE)
    x = x.reshape(x.shape[0], -1)
    x = jax.nn.relu(jnp.dot(x, params["fc1_w"].T, precision=hp) + params["fc1_b"])
    return jnp.dot(x, params["fc2_w"].T, precision=hp) + params["fc2_b"]


if __name__ == "__main__":
    key = jax.random.PRNGKey(0)
    pk, xk, xk2 = jax.random.split(key, 3)
    params = init_params(pk)
    prep = prepare_params(params)     # one-time weight prep (not in the hot path)

    fwd = jax.jit(cnn_forward)

    # Small batch (pads up to one 16-row tile, single grid step).
    B = 2
    x = jax.random.normal(xk, (B, CONV1_IN_CHANNELS, IN_H, IN_W), jnp.float32)
    out = jax.block_until_ready(fwd(prep, x))
    assert out.shape == (B, ACTION_SIZE), out.shape
    assert bool(jnp.all(jnp.isfinite(out)))
    ref = reference_forward(params, x)
    err = float(jnp.max(jnp.abs(out - ref)))
    assert err < 7.5e-2, f"max abs error vs reference (B={B}): {err}"

    # Larger batch: multi-step 'parallel' grid (both v7x TCs) with a masked
    # partial last block instead of padding the activations.
    B2 = 37
    x2 = jax.random.normal(xk2, (B2, CONV1_IN_CHANNELS, IN_H, IN_W), jnp.float32)
    out2 = jax.block_until_ready(fwd(prep, x2))
    assert out2.shape == (B2, ACTION_SIZE), out2.shape
    assert bool(jnp.all(jnp.isfinite(out2)))
    ref2 = reference_forward(params, x2)
    err2 = float(jnp.max(jnp.abs(out2 - ref2)))
    assert err2 < 7.5e-2, f"max abs error vs reference (B={B2}): {err2}"

    print("KERNEL_OK")
</pallas_src>

<mosaic_0001>
module attributes {stable_mosaic.version = 11 : i64} {
  func.func @fused_cnn_kernel(%arg0: i32, %arg1: memref<16x1024xbf16, #tpu.memory_space<vmem>>, %arg2: memref<1024x392xbf16, #tpu.memory_space<vmem>>, %arg3: memref<1x392xf32, #tpu.memory_space<vmem>>, %arg4: memref<392x144xbf16, #tpu.memory_space<vmem>>, %arg5: memref<1x144xf32, #tpu.memory_space<vmem>>, %arg6: memref<144x16xbf16, #tpu.memory_space<vmem>>, %arg7: memref<1x16xf32, #tpu.memory_space<vmem>>, %arg8: memref<16x32xbf16, #tpu.memory_space<vmem>>, %arg9: memref<1x32xf32, #tpu.memory_space<vmem>>, %arg10: memref<32x128xbf16, #tpu.memory_space<vmem>>, %arg11: memref<1x128xf32, #tpu.memory_space<vmem>>, %arg12: memref<16x128xbf16, #tpu.memory_space<vmem>>) attributes {dimension_semantics = [#tpu.dimension_semantics<parallel>], iteration_bounds = array<i64: 1>, scalar_prefetch = 0 : i64, scratch_operands = 0 : i64, tpu.core_type = #tpu.core_type<tc>, window_params = [{transform_indices = @transform_0, window_bounds = array<i64: 16, 1024>}, {pipeline_mode = #tpu.pipeline_mode<synchronous>, transform_indices = @transform_1, window_bounds = array<i64: 1024, 392>}, {pipeline_mode = #tpu.pipeline_mode<synchronous>, transform_indices = @transform_2, window_bounds = array<i64: 1, 392>}, {pipeline_mode = #tpu.pipeline_mode<synchronous>, transform_indices = @transform_3, window_bounds = array<i64: 392, 144>}, {pipeline_mode = #tpu.pipeline_mode<synchronous>, transform_indices = @transform_4, window_bounds = array<i64: 1, 144>}, {pipeline_mode = #tpu.pipeline_mode<synchronous>, transform_indices = @transform_5, window_bounds = array<i64: 144, 16>}, {pipeline_mode = #tpu.pipeline_mode<synchronous>, transform_indices = @transform_6, window_bounds = array<i64: 1, 16>}, {pipeline_mode = #tpu.pipeline_mode<synchronous>, transform_indices = @transform_7, window_bounds = array<i64: 16, 32>}, {pipeline_mode = #tpu.pipeline_mode<synchronous>, transform_indices = @transform_8, window_bounds = array<i64: 1, 32>}, {pipeline_mode = #tpu.pipeline_mode<synchronous>, transform_indices = @transform_9, window_bounds = array<i64: 32, 128>}, {pipeline_mode = #tpu.pipeline_mode<synchronous>, transform_indices = @transform_10, window_bounds = array<i64: 1, 128>}, {transform_indices = @transform_11, window_bounds = array<i64: 16, 128>}]} {
    %c0 = arith.constant 0 : index
    %c0_0 = arith.constant 0 : index
    %0 = vector.load %arg1[%c0, %c0_0] : memref<16x1024xbf16, #tpu.memory_space<vmem>>, vector<16x1024xbf16>
    %c0_1 = arith.constant 0 : index
    %c0_2 = arith.constant 0 : index
    %1 = vector.load %arg2[%c0_1, %c0_2] : memref<1024x392xbf16, #tpu.memory_space<vmem>>, vector<1024x392xbf16>
    %cst = arith.constant dense<0.000000e+00> : vector<16x392xf32>
    %2 = tpu.matmul %0, %1, %cst {dimension_numbers = #tpu.dot_dimension_numbers<[1], [0], [0], [1], [0, 0, 1, 1], [], []>} : vector<16x1024xbf16>, vector<1024x392xbf16>, vector<16x392xf32> -> vector<16x392xf32>
    %c0_3 = arith.constant 0 : index
    %c0_4 = arith.constant 0 : index
    %3 = vector.load %arg3[%c0_3, %c0_4] : memref<1x392xf32, #tpu.memory_space<vmem>>, vector<1x392xf32>
    %4 = vector.broadcast %3 : vector<1x392xf32> to vector<16x392xf32>
    %5 = arith.addf %2, %4 : vector<16x392xf32>
    %cst_5 = arith.constant 0.000000e+00 : f32
    %6 = vector.broadcast %cst_5 : f32 to vector<16x392xf32>
    %7 = arith.maximumf %5, %6 : vector<16x392xf32>
    %8 = arith.truncf %7 : vector<16x392xf32> to vector<16x392xbf16>
    %c0_6 = arith.constant 0 : index
    %c0_7 = arith.constant 0 : index
    %9 = vector.load %arg4[%c0_6, %c0_7] : memref<392x144xbf16, #tpu.memory_space<vmem>>, vector<392x144xbf16>
    %cst_8 = arith.constant dense<0.000000e+00> : vector<16x144xf32>
    %10 = tpu.matmul %8, %9, %cst_8 {dimension_numbers = #tpu.dot_dimension_numbers<[1], [0], [0], [1], [0, 0, 1, 1], [], []>} : vector<16x392xbf16>, vector<392x144xbf16>, vector<16x144xf32> -> vector<16x144xf32>
    %c0_9 = arith.constant 0 : index
    %c0_10 = arith.constant 0 : index
    %11 = vector.load %arg5[%c0_9, %c0_10] : memref<1x144xf32, #tpu.memory_space<vmem>>, vector<1x144xf32>
    %12 = vector.broadcast %11 : vector<1x144xf32> to vector<16x144xf32>
    %13 = arith.addf %10, %12 : vector<16x144xf32>
    %cst_11 = arith.constant 0.000000e+00 : f32
    %14 = vector.broadcast %cst_11 : f32 to vector<16x144xf32>
    %15 = arith.maximumf %13, %14 : vector<16x144xf32>
    %16 = arith.truncf %15 : vector<16x144xf32> to vector<16x144xbf16>
    %c0_12 = arith.constant 0 : index
    %c0_13 = arith.constant 0 : index
    %17 = vector.load %arg6[%c0_12, %c0_13] : memref<144x16xbf16, #tpu.memory_space<vmem>>, vector<144x16xbf16>
    %cst_14 = arith.constant dense<0.000000e+00> : vector<16x16xf32>
    %18 = tpu.matmul %16, %17, %cst_14 {dimension_numbers = #tpu.dot_dimension_numbers<[1], [0], [0], [1], [0, 0, 1, 1], [], []>} : vector<16x144xbf16>, vector<144x16xbf16>, vector<16x16xf32> -> vector<16x16xf32>
    %c0_15 = arith.constant 0 : index
    %c0_16 = arith.constant 0 : index
    %19 = vector.load %arg7[%c0_15, %c0_16] : memref<1x16xf32, #tpu.memory_space<vmem>>, vector<1x16xf32>
    %20 = vector.broadcast %19 : vector<1x16xf32> to vector<16x16xf32>
    %21 = arith.addf %18, %20 : vector<16x16xf32>
    %cst_17 = arith.constant 0.000000e+00 : f32
    %22 = vector.broadcast %cst_17 : f32 to vector<16x16xf32>
    %23 = arith.maximumf %21, %22 : vector<16x16xf32>
    %24 = arith.truncf %23 : vector<16x16xf32> to vector<16x16xbf16>
    %c0_18 = arith.constant 0 : index
    %c0_19 = arith.constant 0 : index
    %25 = vector.load %arg8[%c0_18, %c0_19] : memref<16x32xbf16, #tpu.memory_space<vmem>>, vector<16x32xbf16>
    %cst_20 = arith.constant dense<0.000000e+00> : vector<16x32xf32>
    %26 = tpu.matmul %24, %25, %cst_20 {dimension_numbers = #tpu.dot_dimension_numbers<[1], [0], [0], [1], [0, 0, 1, 1], [], []>} : vector<16x16xbf16>, vector<16x32xbf16>, vector<16x32xf32> -> vector<16x32xf32>
    %c0_21 = arith.constant 0 : index
    %c0_22 = arith.constant 0 : index
    %27 = vector.load %arg9[%c0_21, %c0_22] : memref<1x32xf32, #tpu.memory_space<vmem>>, vector<1x32xf32>
    %28 = vector.broadcast %27 : vector<1x32xf32> to vector<16x32xf32>
    %29 = arith.addf %26, %28 : vector<16x32xf32>
    %cst_23 = arith.constant 0.000000e+00 : f32
    %30 = vector.broadcast %cst_23 : f32 to vector<16x32xf32>
    %31 = arith.maximumf %29, %30 : vector<16x32xf32>
    %32 = arith.truncf %31 : vector<16x32xf32> to vector<16x32xbf16>
    %c0_24 = arith.constant 0 : index
    %c0_25 = arith.constant 0 : index
    %33 = vector.load %arg10[%c0_24, %c0_25] : memref<32x128xbf16, #tpu.memory_space<vmem>>, vector<32x128xbf16>
    %cst_26 = arith.constant dense<0.000000e+00> : vector<16x128xf32>
    %34 = tpu.matmul %32, %33, %cst_26 {dimension_numbers = #tpu.dot_dimension_numbers<[1], [0], [0], [1], [0, 0, 1, 1], [], []>} : vector<16x32xbf16>, vector<32x128xbf16>, vector<16x128xf32> -> vector<16x128xf32>
    %c0_27 = arith.constant 0 : index
    %c0_28 = arith.constant 0 : index
    %35 = vector.load %arg11[%c0_27, %c0_28] : memref<1x128xf32, #tpu.memory_space<vmem>>, vector<1x128xf32>
    %36 = vector.broadcast %35 : vector<1x128xf32> to vector<16x128xf32>
    %37 = arith.addf %34, %36 : vector<16x128xf32>
    %38 = arith.truncf %37 : vector<16x128xf32> to vector<16x128xbf16>
    %c0_29 = arith.constant 0 : index
    %c0_30 = arith.constant 0 : index
    %39 = vector.load %arg12[%c0_29, %c0_30] : memref<16x128xbf16, #tpu.memory_space<vmem>>, vector<16x128xbf16>
    tpu.vector_store %arg12[%c0_29, %c0_30], %38 {strides = array<i32>} : memref<16x128xbf16, #tpu.memory_space<vmem>>, vector<16x128xbf16>,
    return
  }
  func.func @transform_0(%arg0: i32) -> (i32, i32) {
    %c0_i32 = arith.constant 0 : i32
    %c0_i32_0 = arith.constant 0 : i32
    return %arg0, %c0_i32 : i32, i32
  }
  func.func @transform_1(%arg0: i32) -> (i32, i32) {
    %c0_i32 = arith.constant 0 : i32
    %c0_i32_0 = arith.constant 0 : i32
    %c0_i32_1 = arith.constant 0 : i32
    return %c0_i32, %c0_i32_0 : i32, i32
  }
  func.func @transform_2(%arg0: i32) -> (i32, i32) {
    %c0_i32 = arith.constant 0 : i32
    %c0_i32_0 = arith.constant 0 : i32
    %c0_i32_1 = arith.constant 0 : i32
    return %c0_i32, %c0_i32_0 : i32, i32
  }
  func.func @transform_3(%arg0: i32) -> (i32, i32) {
    %c0_i32 = arith.constant 0 : i32
    %c0_i32_0 = arith.constant 0 : i32
    %c0_i32_1 = arith.constant 0 : i32
    return %c0_i32, %c0_i32_0 : i32, i32
  }
  func.func @transform_4(%arg0: i32) -> (i32, i32) {
    %c0_i32 = arith.constant 0 : i32
    %c0_i32_0 = arith.constant 0 : i32
    %c0_i32_1 = arith.constant 0 : i32
    return %c0_i32, %c0_i32_0 : i32, i32
  }
  func.func @transform_5(%arg0: i32) -> (i32, i32) {
    %c0_i32 = arith.constant 0 : i32
    %c0_i32_0 = arith.constant 0 : i32
    %c0_i32_1 = arith.constant 0 : i32
    return %c0_i32, %c0_i32_0 : i32, i32
  }
  func.func @transform_6(%arg0: i32) -> (i32, i32) {
    %c0_i32 = arith.constant 0 : i32
    %c0_i32_0 = arith.constant 0 : i32
    %c0_i32_1 = arith.constant 0 : i32
    return %c0_i32, %c0_i32_0 : i32, i32
  }
  func.func @transform_7(%arg0: i32) -> (i32, i32) {
    %c0_i32 = arith.constant 0 : i32
    %c0_i32_0 = arith.constant 0 : i32
    %c0_i32_1 = arith.constant 0 : i32
    return %c0_i32, %c0_i32_0 : i32, i32
  }
  func.func @transform_8(%arg0: i32) -> (i32, i32) {
    %c0_i32 = arith.constant 0 : i32
    %c0_i32_0 = arith.constant 0 : i32
    %c0_i32_1 = arith.constant 0 : i32
    return %c0_i32, %c0_i32_0 : i32, i32
  }
  func.func @transform_9(%arg0: i32) -> (i32, i32) {
    %c0_i32 = arith.constant 0 : i32
    %c0_i32_0 = arith.constant 0 : i32
    %c0_i32_1 = arith.constant 0 : i32
    return %c0_i32, %c0_i32_0 : i32, i32
  }
  func.func @transform_10(%arg0: i32) -> (i32, i32) {
    %c0_i32 = arith.constant 0 : i32
    %c0_i32_0 = arith.constant 0 : i32
    %c0_i32_1 = arith.constant 0 : i32
    return %c0_i32, %c0_i32_0 : i32, i32
  }
  func.func @transform_11(%arg0: i32) -> (i32, i32) {
    %c0_i32 = arith.constant 0 : i32
    %c0_i32_0 = arith.constant 0 : i32
    return %arg0, %c0_i32 : i32, i32
  }
}

</mosaic_0001>

<bundles_post_ra>
// kernel: cnn_forward.1
= control target key start
LH: loop header
LB: loop body
LE: loop exit
PB: predicated region body
PF: predicated region fallthrough
CT: control target
= control target key end

     0   :  { %vm2397_vm0 = vcmask 1043456   ;;  %vm2393_vm1 = vcmask 64512   ;;  %vm2598_vm2 = vcmask 130048   ;;  %vm2685_vm3 = vcmask 261120   ;;  %s6447_s1 = inlined_call_operand.vmem [shape: bf16[1024,392], index: 1, kind: input, shape index: {}]   ;;  %s6448_s0 = inlined_call_operand.vmem [shape: bf16[16,1024], index: 0, kind: input, shape index: {}]   ;;  %s6449_s2 = inlined_call_operand.vmem [shape: f32[1,392], index: 2, kind: input, shape index: {}]   ;;  %s6450_s3 = inlined_call_operand.vmem [shape: bf16[392,144], index: 3, kind: input, shape index: {}]   ;;  %s6451_s6 = inlined_call_operand.vmem [shape: f32[1,16], index: 6, kind: input, shape index: {}]   ;;  %s6452_s5 = inlined_call_operand.vmem [shape: bf16[144,16], index: 5, kind: input, shape index: {}]   ;;  %s6453_s4 = inlined_call_operand.vmem [shape: f32[1,144], index: 4, kind: input, shape index: {}]   ;;  %s6454_s8 = inlined_call_operand.vmem [shape: f32[1,32], index: 8, kind: input, shape index: {}]   ;;  %s6455_s7 = inlined_call_operand.vmem [shape: bf16[16,32], index: 7, kind: input, shape index: {}]   ;;  %s6456_s9 = inlined_call_operand.vmem [shape: bf16[32,128], index: 9, kind: input, shape index: {}]   ;;  %s6457_s10 = inlined_call_operand.vmem [shape: f32[1,128], index: 10, kind: input, shape index: {}]   ;;  %s6458_s11 = inlined_call_operand.vmem [shape: bf16[16,128], index: 11, kind: output, shape index: {}]  }
   0x1   :  { %v2857_v0 = vld [vmem:[%s6447_s1 + $0xe0] sm:$0xf]  ;;  %v4050_v1 = vld [vmem:[%s6447_s1 + $0xec] sm:$0xf0] }
   0x2   :  { %v2985_v2 = vld [vmem:[%s6447_s1 + $0x1e0] sm:$0xf]  ;;  %v2858_v3 = vor.u32 %v4050_v1, %v2857_v0  ;;  %v4082_v4 = vld [vmem:[%s6447_s1 + $0x1ec] sm:$0xf0] }
   0x3   :  { %v3113_v5 = vld [vmem:[%s6447_s1 + $0x2e0] sm:$0xf]  ;;  %v4114_v6 = vld [vmem:[%s6447_s1 + $0x2ec] sm:$0xf0]  ;;  %v2986_v7 = vor.u32 %v4082_v4, %v2985_v2 }
   0x4   :  { %v3114_v8 = vor.u32 %v4114_v6, %v3113_v5  ;;  %v3241_v9 = vld [vmem:[%s6447_s1 + $0x3e0] sm:$0xf]  ;;  %v4146_v10 = vld [vmem:[%s6447_s1 + $0x3ec] sm:$0xf0]  ;;  %1633 = vmatpush.bf16.msra.mxu0 %v2858_v3 }
   0x5   :  { %v2841_v11 = vld [vmem:[%s6447_s1 + $0xc0] sm:$0xf]  ;;  %v3242_v12 = vor.u32 %v4146_v10, %v3241_v9  ;;  %v4046_v13 = vld [vmem:[%s6447_s1 + $0xcc] sm:$0xf0]  ;;  %1647 = vmatpush.bf16.msra.mxu1 %v2986_v7 }
   0x6   :  { %v2969_v14 = vld [vmem:[%s6447_s1 + $0x1c0] sm:$0xf]  ;;  %v4078_v15 = vld [vmem:[%s6447_s1 + $0x1cc] sm:$0xf0]  ;;  %1661 = vmatpush.bf16.msra.mxu2 %v3114_v8  ;;  %v2842_v16 = vor.u32 %v4046_v13, %v2841_v11 }
   0x7   :  { %v2970_v17 = vor.u32 %v4078_v15, %v2969_v14  ;;  %v3097_v18 = vld [vmem:[%s6447_s1 + $0x2c0] sm:$0xf]  ;;  %v4110_v19 = vld [vmem:[%s6447_s1 + $0x2cc] sm:$0xf0]  ;;  %1675 = vmatpush.bf16.msra.mxu3 %v3242_v12 }
   0x8   :  { %v3225_v20 = vld [vmem:[%s6447_s1 + $0x3c0] sm:$0xf]  ;;  %v3098_v21 = vor.u32 %v4110_v19, %v3097_v18  ;;  %v4142_v22 = vld [vmem:[%s6447_s1 + $0x3cc] sm:$0xf0]  ;;  %1634 = vmatpush.bf16.msra.mxu0 %v2842_v16 }
   0x9   :  { %v2825_v23 = vld [vmem:[%s6447_s1 + $0xa0] sm:$0xf]  ;;  %v4042_v24 = vld [vmem:[%s6447_s1 + $0xac] sm:$0xf0]  ;;  %v3226_v25 = vor.u32 %v4142_v22, %v3225_v20  ;;  %1648 = vmatpush.bf16.msra.mxu1 %v2970_v17 }
   0xa   :  { %v2953_v26 = vld [vmem:[%s6447_s1 + $0x1a0] sm:$0xf]  ;;  %v4074_v27 = vld [vmem:[%s6447_s1 + $0x1ac] sm:$0xf0]  ;;  %v2826_v29 = vor.u32 %v4042_v24, %v2825_v23  ;;  %1662 = vmatpush.bf16.msra.mxu2 %v3098_v21 }
   0xb   :  { %v3081_v28 = vld [vmem:[%s6447_s1 + $0x2a0] sm:$0xf]  ;;  %v4106_v30 = vld [vmem:[%s6447_s1 + $0x2ac] sm:$0xf0]  ;;  %v2954_v33 = vor.u32 %v4074_v27, %v2953_v26  ;;  %1676 = vmatpush.bf16.msra.mxu3 %v3226_v25 }
   0xc   :  { %v3209_v31 = vld [vmem:[%s6447_s1 + $0x3a0] sm:$0xf]  ;;  %v4138_v32 = vld [vmem:[%s6447_s1 + $0x3ac] sm:$0xf0]  ;;  %v3082_v34 = vor.u32 %v4106_v30, %v3081_v28  ;;  %1635 = vmatpush.bf16.msra.mxu0 %v2826_v29 }
   0xd   :  { %v2809_v35 = vld [vmem:[%s6447_s1 + $0x80] sm:$0xf]  ;;  %v4038_v36 = vld [vmem:[%s6447_s1 + $0x8c] sm:$0xf0]  ;;  %v3210_v38 = vor.u32 %v4138_v32, %v3209_v31  ;;  %1649 = vmatpush.bf16.msra.mxu1 %v2954_v33 }
   0xe   :  { %v2937_v37 = vld [vmem:[%s6447_s1 + $0x180] sm:$0xf]  ;;  %v4070_v39 = vld [vmem:[%s6447_s1 + $0x18c] sm:$0xf0]  ;;  %v2810_v44 = vor.u32 %v4038_v36, %v2809_v35  ;;  %1663 = vmatpush.bf16.msra.mxu2 %v3082_v34 }
   0xf   :  { %v3065_v40 = vld [vmem:[%s6447_s1 + $0x280] sm:$0xf]  ;;  %v4102_v41 = vld [vmem:[%s6447_s1 + $0x28c] sm:$0xf0]  ;;  %v2938_v45 = vor.u32 %v4070_v39, %v2937_v37  ;;  %1677 = vmatpush.bf16.msra.mxu3 %v3210_v38 }
  0x10   :  { %v3193_v42 = vld [vmem:[%s6447_s1 + $0x380] sm:$0xf]  ;;  %v4134_v43 = vld [vmem:[%s6447_s1 + $0x38c] sm:$0xf0]  ;;  %v3066_v46 = vor.u32 %v4102_v41, %v3065_v40  ;;  %1636 = vmatpush.bf16.msra.mxu0 %v2810_v44 }
  0x11   :  { %v2793_v47 = vld [vmem:[%s6447_s1 + $0x60] sm:$0xf]  ;;  %v4034_v48 = vld [vmem:[%s6447_s1 + $0x6c] sm:$0xf0]  ;;  %v3194_v50 = vor.u32 %v4134_v43, %v3193_v42  ;;  %1650 = vmatpush.bf16.msra.mxu1 %v2938_v45 }
  0x12   :  { %v2921_v49 = vld [vmem:[%s6447_s1 + $0x160] sm:$0xf]  ;;  %v4066_v51 = vld [vmem:[%s6447_s1 + $0x16c] sm:$0xf0]  ;;  %v2794_v56 = vor.u32 %v4034_v48, %v2793_v47  ;;  %1664 = vmatpush.bf16.msra.mxu2 %v3066_v46 }
  0x13   :  { %v3049_v52 = vld [vmem:[%s6447_s1 + $0x260] sm:$0xf]  ;;  %v4098_v53 = vld [vmem:[%s6447_s1 + $0x26c] sm:$0xf0]  ;;  %v2922_v57 = vor.u32 %v4066_v51, %v2921_v49  ;;  %1678 = vmatpush.bf16.msra.mxu3 %v3194_v50 }
  0x14   :  { %v3177_v54 = vld [vmem:[%s6447_s1 + $0x360] sm:$0xf]  ;;  %v4130_v55 = vld [vmem:[%s6447_s1 + $0x36c] sm:$0xf0]  ;;  %v3050_v58 = vor.u32 %v4098_v53, %v3049_v52  ;;  %1637 = vmatpush.bf16.msra.mxu0 %v2794_v56 }
  0x15   :  { %v2777_v59 = vld [vmem:[%s6447_s1 + $0x40] sm:$0xf]  ;;  %v4030_v60 = vld [vmem:[%s6447_s1 + $0x4c] sm:$0xf0]  ;;  %v3178_v62 = vor.u32 %v4130_v55, %v3177_v54  ;;  %1651 = vmatpush.bf16.msra.mxu1 %v2922_v57  ;;  %v2721_v54 = vld [vmem:[%s6448_s0 + $0x8] sm:$0xf] }
  0x16   :  { %v2905_v61 = vld [vmem:[%s6447_s1 + $0x140] sm:$0xf]  ;;  %v4062_v63 = vld [vmem:[%s6447_s1 + $0x14c] sm:$0xf0]  ;;  %v2778_v4 = vor.u32 %v4030_v60, %v2777_v59  ;;  %1665 = vmatpush.bf16.msra.mxu2 %v3050_v58  ;;  %v4017_v59 = vld [vmem:[%s6448_s0 + $0x24] sm:$0xf0] }
  0x17   :  { %v3033_v0 = vld [vmem:[%s6447_s1 + $0x240] sm:$0xf]  ;;  %v4094_v1 = vld [vmem:[%s6447_s1 + $0x24c] sm:$0xf0]  ;;  %v2906_v5 = vor.u32 %v4062_v63, %v2905_v61  ;;  %1679 = vmatpush.bf16.msra.mxu3 %v3178_v62 }
  0x18   :  { %v3161_v2 = vld [vmem:[%s6447_s1 + $0x340] sm:$0xf]  ;;  %v4126_v3 = vld [vmem:[%s6447_s1 + $0x34c] sm:$0xf0]  ;;  %v3034_v6 = vor.u32 %v4094_v1, %v3033_v0  ;;  %1638 = vmatpush.bf16.msra.mxu0 %v2778_v4  ;;  %v4673_v1 = vor.u32 %v4017_v59, %v2721_v54 }
  0x19   :  { %v2761_v7 = vld [vmem:[%s6447_s1 + $0x20] sm:$0xf]  ;;  %v4026_v8 = vld [vmem:[%s6447_s1 + $0x2c] sm:$0xf0]  ;;  %v3162_v10 = vor.u32 %v4126_v3, %v3161_v2  ;;  %1652 = vmatpush.bf16.msra.mxu1 %v2906_v5 }
  0x1a   :  { %v2889_v9 = vld [vmem:[%s6447_s1 + $0x120] sm:$0xf]  ;;  %v4058_v11 = vld [vmem:[%s6447_s1 + $0x12c] sm:$0xf0]  ;;  %v2762_v16 = vor.u32 %v4026_v8, %v2761_v7  ;;  %1666 = vmatpush.bf16.msra.mxu2 %v3034_v6  ;;  %v4012_v6 = vld [vmem:[%s6448_s0 + $0x4] sm:$0xf] }
  0x1b   :  { %v3017_v12 = vld [vmem:[%s6447_s1 + $0x220] sm:$0xf]  ;;  %v4090_v13 = vld [vmem:[%s6447_s1 + $0x22c] sm:$0xf0]  ;;  %v2890_v19 = vor.u32 %v4058_v11, %v2889_v9  ;;  %1680 = vmatpush.bf16.msra.mxu3 %v3162_v10  ;;  %v2715_v7 = vld [vmem:[%s6448_s0 + $0x20] sm:$0xf0] }
  0x1c   :  { %v3145_v14 = vld [vmem:[%s6447_s1 + $0x320] sm:$0xf]  ;;  %v4122_v15 = vld [vmem:[%s6447_s1 + $0x32c] sm:$0xf0]  ;;  %v3018_v20 = vor.u32 %v4090_v13, %v3017_v12  ;;  %1639 = vmatpush.bf16.msra.mxu0 %v2762_v16  ;;  %v4013_v8 = vld [vmem:[%s6448_s0 + $0xc] sm:$0xf]  ;;  %v4695_v10 = vor.u32 %v4012_v6, %v2715_v7 }
  0x1d   :  { %v2745_v17 = vld [vmem:[%s6447_s1] sm:$0xf]  ;;  %v4022_v18 = vld [vmem:[%s6447_s1 + $0xc] sm:$0xf0]  ;;  %v3146_v24 = vor.u32 %v4122_v15, %v3145_v14  ;;  %1653 = vmatpush.bf16.msra.mxu1 %v2890_v19  ;;  %v2723_v11 = vld [vmem:[%s6448_s0 + $0x28] sm:$0xf0] }
  0x1e   :  { %v2873_v21 = vld [vmem:[%s6447_s1 + $0x100] sm:$0xf]  ;;  %v4054_v22 = vld [vmem:[%s6447_s1 + $0x10c] sm:$0xf0]  ;;  %v2746_v31 = vor.u32 %v4022_v18, %v2745_v17  ;;  %1667 = vmatpush.bf16.msra.mxu2 %v3018_v20  ;;  %v4709_v17 = vor.u32 %v4013_v8, %v2723_v11 }
  0x1f   :  { %v3001_v23 = vld [vmem:[%s6447_s1 + $0x200] sm:$0xf]  ;;  %v4086_v25 = vld [vmem:[%s6447_s1 + $0x20c] sm:$0xf0]  ;;  %v2874_v35 = vor.u32 %v4054_v22, %v2873_v21  ;;  %1681 = vmatpush.bf16.msra.mxu3 %v3146_v24 }
  0x20   :  { %v3129_v26 = vld [vmem:[%s6447_s1 + $0x300] sm:$0xf]  ;;  %v4118_v27 = vld [vmem:[%s6447_s1 + $0x30c] sm:$0xf0]  ;;  %v3002_v36 = vor.u32 %v4086_v25, %v3001_v23  ;;  %1640 = vmatpush.bf16.msra.mxu0 %v2746_v31 }
  0x21   :  { %v3369_v28 = vld [vmem:[%s6447_s1 + $0x4e0] sm:$0xf]  ;;  %v4178_v29 = vld [vmem:[%s6447_s1 + $0x4ec] sm:$0xf0]  ;;  %v3130_v39 = vor.u32 %v4118_v27, %v3129_v26  ;;  %1654 = vmatpush.bf16.msra.mxu1 %v2874_v35 }
  0x22   :  { %v3497_v30 = vld [vmem:[%s6447_s1 + $0x5e0] sm:$0xf]  ;;  %v4210_v32 = vld [vmem:[%s6447_s1 + $0x5ec] sm:$0xf0]  ;;  %v3370_v40 = vor.u32 %v4178_v29, %v3369_v28  ;;  %1668 = vmatpush.bf16.msra.mxu2 %v3002_v36 }
  0x23   :  { %v3625_v33 = vld [vmem:[%s6447_s1 + $0x6e0] sm:$0xf]  ;;  %v4242_v34 = vld [vmem:[%s6447_s1 + $0x6ec] sm:$0xf0]  ;;  %v3498_v43 = vor.u32 %v4210_v32, %v3497_v30  ;;  %1682 = vmatpush.bf16.msra.mxu3 %v3130_v39 }
  0x24   :  { %v3753_v37 = vld [vmem:[%s6447_s1 + $0x7e0] sm:$0xf]  ;;  %v4274_v38 = vld [vmem:[%s6447_s1 + $0x7ec] sm:$0xf0]  ;;  %v3626_v44 = vor.u32 %v4242_v34, %v3625_v33  ;;  %1689 = vmatpush.bf16.msrb.mxu0 %v3370_v40  ;;  %1655 = vmatmul.bf16.vlgmr.msra.gmra.mxu1 %v4695_v10 }
  0x25   :  { %v3353_v41 = vld [vmem:[%s6447_s1 + $0x4c0] sm:$0xf]  ;;  %v4174_v42 = vld [vmem:[%s6447_s1 + $0x4cc] sm:$0xf0]  ;;  %v3754_v48 = vor.u32 %v4274_v38, %v3753_v37  ;;  %1703 = vmatpush.bf16.msrb.mxu1 %v3498_v43  ;;  %1669 = vmatmul.bf16.vlgmr.msra.gmra.mxu2 %v4673_v1 }
  0x26   :  { %v3481_v45 = vld [vmem:[%s6447_s1 + $0x5c0] sm:$0xf]  ;;  %v4206_v46 = vld [vmem:[%s6447_s1 + $0x5cc] sm:$0xf0]  ;;  %v3354_v55 = vor.u32 %v4174_v42, %v3353_v41  ;;  %1717 = vmatpush.bf16.msrb.mxu2 %v3626_v44  ;;  %1683 = vmatmul.bf16.vlgmr.msra.gmra.mxu3 %v4709_v17 }
  0x27   :  { %v3609_v47 = vld [vmem:[%s6447_s1 + $0x6c0] sm:$0xf]  ;;  %v4238_v49 = vld [vmem:[%s6447_s1 + $0x6cc] sm:$0xf0]  ;;  %v3482_v60 = vor.u32 %v4206_v46, %v3481_v45  ;;  %1731 = vmatpush.bf16.msrb.mxu3 %v3754_v48 }
  0x28   :  { %v3737_v50 = vld [vmem:[%s6447_s1 + $0x7c0] sm:$0xf]  ;;  %v4270_v51 = vld [vmem:[%s6447_s1 + $0x7cc] sm:$0xf0]  ;;  %v3610_v61 = vor.u32 %v4238_v49, %v3609_v47  ;;  %1690 = vmatpush.bf16.msrb.mxu0 %v3354_v55 }
  0x29   :  { %v2713_v52 = vld [vmem:[%s6448_s0] sm:$0xf]  ;;  %v4170_v57 = vld [vmem:[%s6447_s1 + $0x4ac] sm:$0xf0]  ;;  %v3738_v2 = vor.u32 %v4270_v51, %v3737_v50  ;;  %1704 = vmatpush.bf16.msrb.mxu1 %v3482_v60 }
  0x2a   :  { %v4016_v53 = vld [vmem:[%s6448_s0 + $0x1c] sm:$0xf0]  ;;  %v4202_v63 = vld [vmem:[%s6447_s1 + $0x5ac] sm:$0xf0]  ;;  %1718 = vmatpush.bf16.msrb.mxu2 %v3610_v61 }
  0x2b   :  { %v3337_v56 = vld [vmem:[%s6447_s1 + $0x4a0] sm:$0xf]  ;;  %v4659_v58 = vor.u32 %v4016_v53, %v2713_v52  ;;  %v4234_v3 = vld [vmem:[%s6447_s1 + $0x6ac] sm:$0xf0]  ;;  %1732 = vmatpush.bf16.msrb.mxu3 %v3738_v2 }
  0x2c   :  { %v3465_v62 = vld [vmem:[%s6447_s1 + $0x5a0] sm:$0xf]  ;;  %v4266_v5 = vld [vmem:[%s6447_s1 + $0x7ac] sm:$0xf0]  ;;  %v3338_v9 = vor.u32 %v4170_v57, %v3337_v56 }
  0x2d   :  { %v3593_v0 = vld [vmem:[%s6447_s1 + $0x6a0] sm:$0xf]  ;;  %1641 = vmatmul.bf16.vlgmr.msra.gmra.mxu0 %v4659_v58  ;;  %v3466_v12 = vor.u32 %v4202_v63, %v3465_v62  ;;  %v4166_v15 = vld [vmem:[%s6447_s1 + $0x48c] sm:$0xf0] }
  0x2e   :  { %v3721_v4 = vld [vmem:[%s6447_s1 + $0x7a0] sm:$0xf]  ;;  %v3594_v13 = vor.u32 %v4234_v3, %v3593_v0  ;;  %v4198_v19 = vld [vmem:[%s6447_s1 + $0x58c] sm:$0xf0]  ;;  %1691 = vmatpush.bf16.msrb.mxu0 %v3338_v9  ;;  %v4048_v9 = vld [vmem:[%s6447_s1 + $0xe4] sm:$0xf] }
  0x2f   :  { %v3321_v14 = vld [vmem:[%s6447_s1 + $0x480] sm:$0xf]  ;;  %v3722_v18 = vor.u32 %v4266_v5, %v3721_v4  ;;  %v4230_v21 = vld [vmem:[%s6447_s1 + $0x68c] sm:$0xf0]  ;;  %1705 = vmatpush.bf16.msrb.mxu1 %v3466_v12  ;;  %v2859_v12 = vld [vmem:[%s6447_s1 + $0xf0] sm:$0xf0] }
  0x30   :  { %v3449_v16 = vld [vmem:[%s6447_s1 + $0x580] sm:$0xf]  ;;  %v4262_v23 = vld [vmem:[%s6447_s1 + $0x78c] sm:$0xf0]  ;;  %v3322_v24 = vor.u32 %v4166_v15, %v3321_v14  ;;  %1719 = vmatpush.bf16.msrb.mxu2 %v3594_v13  ;;  %v4080_v13 = vld [vmem:[%s6447_s1 + $0x1e4] sm:$0xf] }
  0x31   :  { %v3577_v20 = vld [vmem:[%s6447_s1 + $0x680] sm:$0xf]  ;;  %v3450_v25 = vor.u32 %v4198_v19, %v3449_v16  ;;  %v4162_v28 = vld [vmem:[%s6447_s1 + $0x46c] sm:$0xf0]  ;;  %1733 = vmatpush.bf16.msrb.mxu3 %v3722_v18  ;;  %v2987_v14 = vld [vmem:[%s6447_s1 + $0x1f0] sm:$0xf0] }
  0x32   :  { %v3705_v22 = vld [vmem:[%s6447_s1 + $0x780] sm:$0xf]  ;;  %v3578_v26 = vor.u32 %v4230_v21, %v3577_v20  ;;  %v4194_v31 = vld [vmem:[%s6447_s1 + $0x56c] sm:$0xf0]  ;;  %1692 = vmatpush.bf16.msrb.mxu0 %v3322_v24  ;;  %v4112_v15 = vld [vmem:[%s6447_s1 + $0x2e4] sm:$0xf] }
  0x33   :  { %v3305_v27 = vld [vmem:[%s6447_s1 + $0x460] sm:$0xf]  ;;  %v3706_v30 = vor.u32 %v4262_v23, %v3705_v22  ;;  %v4226_v33 = vld [vmem:[%s6447_s1 + $0x66c] sm:$0xf0]  ;;  %1706 = vmatpush.bf16.msrb.mxu1 %v3450_v25  ;;  %v3115_v16 = vld [vmem:[%s6447_s1 + $0x2f0] sm:$0xf0] }
  0x34   :  { %v3433_v29 = vld [vmem:[%s6447_s1 + $0x560] sm:$0xf]  ;;  %v4258_v35 = vld [vmem:[%s6447_s1 + $0x76c] sm:$0xf0]  ;;  %v3306_v36 = vor.u32 %v4162_v28, %v3305_v27  ;;  %1720 = vmatpush.bf16.msrb.mxu2 %v3578_v26  ;;  %v4144_v18 = vld [vmem:[%s6447_s1 + $0x3e4] sm:$0xf] }
  0x35   :  { %v3561_v32 = vld [vmem:[%s6447_s1 + $0x660] sm:$0xf]  ;;  %v3434_v37 = vor.u32 %v4194_v31, %v3433_v29  ;;  %v4158_v40 = vld [vmem:[%s6447_s1 + $0x44c] sm:$0xf0]  ;;  %1734 = vmatpush.bf16.msrb.mxu3 %v3706_v30  ;;  %v3243_v20 = vld [vmem:[%s6447_s1 + $0x3f0] sm:$0xf0]  ;;  %v2862_v29 = vor.u32 %v4048_v9, %v2859_v12 }
  0x36   :  { %v3689_v34 = vld [vmem:[%s6447_s1 + $0x760] sm:$0xf]  ;;  %v3562_v38 = vor.u32 %v4226_v33, %v3561_v32  ;;  %v4190_v43 = vld [vmem:[%s6447_s1 + $0x54c] sm:$0xf0]  ;;  %1693 = vmatpush.bf16.msrb.mxu0 %v3306_v36  ;;  %v2737_v25 = vld [vmem:[%s6448_s0 + $0x18] sm:$0xf]  ;;  %v2990_v33 = vor.u32 %v4080_v13, %v2987_v14 }
  0x37   :  { %v3289_v39 = vld [vmem:[%s6447_s1 + $0x440] sm:$0xf]  ;;  %v3690_v42 = vor.u32 %v4258_v35, %v3689_v34  ;;  %v4222_v45 = vld [vmem:[%s6447_s1 + $0x64c] sm:$0xf0]  ;;  %1707 = vmatpush.bf16.msrb.mxu1 %v3434_v37  ;;  %v4019_v26 = vld [vmem:[%s6448_s0 + $0x34] sm:$0xf0]  ;;  %v3118_v34 = vor.u32 %v4112_v15, %v3115_v16 }
  0x38   :  { %v3417_v41 = vld [vmem:[%s6447_s1 + $0x540] sm:$0xf]  ;;  %v4254_v47 = vld [vmem:[%s6447_s1 + $0x74c] sm:$0xf0]  ;;  %v3290_v48 = vor.u32 %v4158_v40, %v3289_v39  ;;  %1721 = vmatpush.bf16.msrb.mxu2 %v3562_v38  ;;  %v4014_v27 = vld [vmem:[%s6448_s0 + $0x14] sm:$0xf]  ;;  %v3246_v38 = vor.u32 %v4144_v18, %v3243_v20 }
  0x39   :  { %v3545_v44 = vld [vmem:[%s6447_s1 + $0x640] sm:$0xf]  ;;  %v3418_v50 = vor.u32 %v4190_v43, %v3417_v41  ;;  %v4154_v52 = vld [vmem:[%s6447_s1 + $0x42c] sm:$0xf0]  ;;  %1735 = vmatpush.bf16.msrb.mxu3 %v3690_v42  ;;  %v2731_v30 = vld [vmem:[%s6448_s0 + $0x30] sm:$0xf0]  ;;  %v4892_v43 = vor.u32 %v4019_v26, %v2737_v25 }
  0x3a   :  { %v3673_v46 = vld [vmem:[%s6447_s1 + $0x740] sm:$0xf]  ;;  %v3546_v51 = vor.u32 %v4222_v45, %v3545_v44  ;;  %v4186_v54 = vld [vmem:[%s6447_s1 + $0x52c] sm:$0xf0]  ;;  %1694 = vmatpush.bf16.msrb.mxu0 %v3290_v48  ;;  %v4015_v31 = vld [vmem:[%s6448_s0 + $0x1c] sm:$0xf]  ;;  %v4894_v44 = vor.u32 %v4014_v27, %v2731_v30 }
  0x3b   :  { %v3273_v49 = vld [vmem:[%s6447_s1 + $0x420] sm:$0xf]  ;;  %v3674_v55 = vor.u32 %v4254_v47, %v3673_v46  ;;  %v4218_v57 = vld [vmem:[%s6447_s1 + $0x62c] sm:$0xf0]  ;;  %1708 = vmatpush.bf16.msrb.mxu1 %v3418_v50  ;;  %v2739_v32 = vld [vmem:[%s6448_s0 + $0x38] sm:$0xf0] }
  0x3c   :  { %v3401_v53 = vld [vmem:[%s6447_s1 + $0x520] sm:$0xf]  ;;  %v4250_v60 = vld [vmem:[%s6447_s1 + $0x72c] sm:$0xf0]  ;;  %v3274_v63 = vor.u32 %v4154_v52, %v3273_v49  ;;  %1722 = vmatpush.bf16.msrb.mxu2 %v3546_v51  ;;  %v4044_v35 = vld [vmem:[%s6447_s1 + $0xc4] sm:$0xf]  ;;  %v4902_v47 = vor.u32 %v4015_v31, %v2739_v32 }
  0x3d   :  { %v3529_v56 = vld [vmem:[%s6447_s1 + $0x620] sm:$0xf]  ;;  %v4150_v62 = vld [vmem:[%s6447_s1 + $0x40c] sm:$0xf0]  ;;  %v3402_v5 = vor.u32 %v4186_v54, %v3401_v53  ;;  %1736 = vmatpush.bf16.msrb.mxu3 %v3674_v55  ;;  %v2843_v36 = vld [vmem:[%s6447_s1 + $0xd0] sm:$0xf0] }
  0x3e   :  { %v3657_v59 = vld [vmem:[%s6447_s1 + $0x720] sm:$0xf]  ;;  %v4182_v2 = vld [vmem:[%s6447_s1 + $0x50c] sm:$0xf0]  ;;  %v3530_v6 = vor.u32 %v4218_v57, %v3529_v56  ;;  %1695 = vmatpush.bf16.msrb.mxu0 %v3274_v63  ;;  %v4076_v37 = vld [vmem:[%s6447_s1 + $0x1c4] sm:$0xf]  ;;  %v2846_v48 = vor.u32 %v4044_v35, %v2843_v36 }
  0x3f   :  { %v3257_v61 = vld [vmem:[%s6447_s1 + $0x400] sm:$0xf]  ;;  %v4214_v4 = vld [vmem:[%s6447_s1 + $0x60c] sm:$0xf0]  ;;  %v3658_v11 = vor.u32 %v4250_v60, %v3657_v59  ;;  %1709 = vmatpush.bf16.msrb.mxu1 %v3402_v5  ;;  %v2971_v40 = vld [vmem:[%s6447_s1 + $0x1d0] sm:$0xf0] }
  0x40   :  { %v3385_v0 = vld [vmem:[%s6447_s1 + $0x500] sm:$0xf]  ;;  %v4246_v8 = vld [vmem:[%s6447_s1 + $0x70c] sm:$0xf0]  ;;  %v3258_v19 = vor.u32 %v4150_v62, %v3257_v61  ;;  %1723 = vmatpush.bf16.msrb.mxu2 %v3530_v6  ;;  %v4108_v41 = vld [vmem:[%s6447_s1 + $0x2c4] sm:$0xf]  ;;  %v2974_v49 = vor.u32 %v4076_v37, %v2971_v40 }
  0x41   :  { %v3513_v3 = vld [vmem:[%s6447_s1 + $0x600] sm:$0xf]  ;;  %v2729_v21 = vld [vmem:[%s6448_s0 + $0x10] sm:$0xf]  ;;  %v3386_v23 = vor.u32 %v4182_v2, %v3385_v0  ;;  %1737 = vmatpush.bf16.msrb.mxu3 %v3658_v11  ;;  %v3099_v42 = vld [vmem:[%s6447_s1 + $0x2d0] sm:$0xf0] }
  0x42   :  { %v3641_v7 = vld [vmem:[%s6447_s1 + $0x700] sm:$0xf]  ;;  %v4018_v22 = vld [vmem:[%s6448_s0 + $0x2c] sm:$0xf0]  ;;  %v3514_v24 = vor.u32 %v4214_v4, %v3513_v3  ;;  %1696 = vmatpush.bf16.msrb.mxu0 %v3258_v19  ;;  %v4140_v45 = vld [vmem:[%s6447_s1 + $0x3c4] sm:$0xf]  ;;  %v3102_v50 = vor.u32 %v4108_v41, %v3099_v42 }
  0x43   :  { %v3642_v28 = vor.u32 %v4246_v8, %v3641_v7  ;;  %v4881_v39 = vor.u32 %v4018_v22, %v2729_v21  ;;  %1710 = vmatpush.bf16.msrb.mxu1 %v3386_v23  ;;  %v3227_v46 = vld [vmem:[%s6447_s1 + $0x3d0] sm:$0xf0]  ;;  %v4040_v51 = vld [vmem:[%s6447_s1 + $0xa4] sm:$0xf] }
  0x44   :  { %1724 = vmatpush.bf16.msrb.mxu2 %v3514_v24  ;;  %v2827_v52 = vld [vmem:[%s6447_s1 + $0xb0] sm:$0xf0]  ;;  %v4072_v53 = vld [vmem:[%s6447_s1 + $0x1a4] sm:$0xf]  ;;  %v3230_v54 = vor.u32 %v4140_v45, %v3227_v46 }
  0x45   :  { %1738 = vmatpush.bf16.msrb.mxu3 %v3642_v28  ;;  %1697 = vmatmul.bf16.vlgmr.msrb.gmra.mxu0 %v4881_v39  ;;  %v2955_v55 = vld [vmem:[%s6447_s1 + $0x1b0] sm:$0xf0]  ;;  %v4104_v56 = vld [vmem:[%s6447_s1 + $0x2a4] sm:$0xf]  ;;  %v2830_v61 = vor.u32 %v4040_v51, %v2827_v52 }
  0x46   :  { %1745 = vmatpush.bf16.msra.mxu0 %v2862_v29  ;;  %v3083_v57 = vld [vmem:[%s6447_s1 + $0x2b0] sm:$0xf0]  ;;  %1711 = vmatmul.bf16.vlgmr.msrb.gmra.mxu1 %v4894_v44  ;;  %v4136_v59 = vld [vmem:[%s6447_s1 + $0x3a4] sm:$0xf]  ;;  %v2958_v62 = vor.u32 %v4072_v53, %v2955_v55 }
  0x47   :  { %1759 = vmatpush.bf16.msra.mxu1 %v2990_v33  ;;  %1725 = vmatmul.bf16.vlgmr.msrb.gmra.mxu2 %v4892_v43  ;;  %v3211_v60 = vld [vmem:[%s6447_s1 + $0x3b0] sm:$0xf0]  ;;  %v3086_v63 = vor.u32 %v4104_v56, %v3083_v57  ;;  %v4036_v0 = vld [vmem:[%s6447_s1 + $0x84] sm:$0xf] }
  0x48   :  { %1773 = vmatpush.bf16.msra.mxu2 %v3118_v34  ;;  %1739 = vmatmul.bf16.vlgmr.msrb.gmra.mxu3 %v4902_v47  ;;  %v2811_v2 = vld [vmem:[%s6447_s1 + $0x90] sm:$0xf0]  ;;  %v4068_v3 = vld [vmem:[%s6447_s1 + $0x184] sm:$0xf]  ;;  %v3214_v4 = vor.u32 %v4136_v59, %v3211_v60 }
  0x49   :  { %1787 = vmatpush.bf16.msra.mxu3 %v3246_v38  ;;  %v2939_v5 = vld [vmem:[%s6447_s1 + $0x190] sm:$0xf0]  ;;  %v4100_v6 = vld [vmem:[%s6447_s1 + $0x284] sm:$0xf]  ;;  %v2814_v11 = vor.u32 %v4036_v0, %v2811_v2 }
  0x4a   :  { %1746 = vmatpush.bf16.msra.mxu0 %v2846_v48  ;;  %v3067_v7 = vld [vmem:[%s6447_s1 + $0x290] sm:$0xf0]  ;;  %v4132_v8 = vld [vmem:[%s6447_s1 + $0x384] sm:$0xf]  ;;  %v2942_v12 = vor.u32 %v4068_v3, %v2939_v5 }
  0x4b   :  { %1760 = vmatpush.bf16.msra.mxu1 %v2974_v49  ;;  %v3195_v9 = vld [vmem:[%s6447_s1 + $0x390] sm:$0xf0]  ;;  %v3070_v13 = vor.u32 %v4100_v6, %v3067_v7  ;;  %v4032_v14 = vld [vmem:[%s6447_s1 + $0x64] sm:$0xf] }
  0x4c   :  { %1774 = vmatpush.bf16.msra.mxu2 %v3102_v50  ;;  %v2795_v15 = vld [vmem:[%s6447_s1 + $0x70] sm:$0xf0]  ;;  %v4064_v16 = vld [vmem:[%s6447_s1 + $0x164] sm:$0xf]  ;;  %v3198_v18 = vor.u32 %v4132_v8, %v3195_v9 }
  0x4d   :  { %1788 = vmatpush.bf16.msra.mxu3 %v3230_v54  ;;  %v2923_v19 = vld [vmem:[%s6447_s1 + $0x170] sm:$0xf0]  ;;  %v4096_v20 = vld [vmem:[%s6447_s1 + $0x264] sm:$0xf]  ;;  %v2798_v24 = vor.u32 %v4032_v14, %v2795_v15 }
  0x4e   :  { %1747 = vmatpush.bf16.msra.mxu0 %v2830_v61  ;;  %v3051_v21 = vld [vmem:[%s6447_s1 + $0x270] sm:$0xf0]  ;;  %v4128_v22 = vld [vmem:[%s6447_s1 + $0x364] sm:$0xf]  ;;  %v2926_v25 = vor.u32 %v4064_v16, %v2923_v19 }
  0x4f   :  { %1761 = vmatpush.bf16.msra.mxu1 %v2958_v62  ;;  %v3179_v23 = vld [vmem:[%s6447_s1 + $0x370] sm:$0xf0]  ;;  %v3054_v26 = vor.u32 %v4096_v20, %v3051_v21  ;;  %v4028_v27 = vld [vmem:[%s6447_s1 + $0x44] sm:$0xf] }
  0x50   :  { %1775 = vmatpush.bf16.msra.mxu2 %v3086_v63  ;;  %v2779_v28 = vld [vmem:[%s6447_s1 + $0x50] sm:$0xf0]  ;;  %v4060_v29 = vld [vmem:[%s6447_s1 + $0x144] sm:$0xf]  ;;  %v3182_v30 = vor.u32 %v4128_v22, %v3179_v23 }
  0x51   :  { %1789 = vmatpush.bf16.msra.mxu3 %v3214_v4  ;;  %v2907_v31 = vld [vmem:[%s6447_s1 + $0x150] sm:$0xf0]  ;;  %v4092_v32 = vld [vmem:[%s6447_s1 + $0x244] sm:$0xf]  ;;  %v2782_v36 = vor.u32 %v4028_v27, %v2779_v28 }
  0x52   :  { %1748 = vmatpush.bf16.msra.mxu0 %v2814_v11  ;;  %v3035_v33 = vld [vmem:[%s6447_s1 + $0x250] sm:$0xf0]  ;;  %v4124_v34 = vld [vmem:[%s6447_s1 + $0x344] sm:$0xf]  ;;  %v2910_v37 = vor.u32 %v4060_v29, %v2907_v31 }
  0x53   :  { %1762 = vmatpush.bf16.msra.mxu1 %v2942_v12  ;;  %v3163_v35 = vld [vmem:[%s6447_s1 + $0x350] sm:$0xf0]  ;;  %v3038_v38 = vor.u32 %v4092_v32, %v3035_v33  ;;  %v4024_v40 = vld [vmem:[%s6447_s1 + $0x24] sm:$0xf] }
  0x54   :  { %1776 = vmatpush.bf16.msra.mxu2 %v3070_v13  ;;  %v2763_v41 = vld [vmem:[%s6447_s1 + $0x30] sm:$0xf0]  ;;  %v4056_v42 = vld [vmem:[%s6447_s1 + $0x124] sm:$0xf]  ;;  %v3166_v45 = vor.u32 %v4124_v34, %v3163_v35 }
  0x55   :  { %1790 = vmatpush.bf16.msra.mxu3 %v3198_v18  ;;  %v2891_v46 = vld [vmem:[%s6447_s1 + $0x130] sm:$0xf0]  ;;  %v4088_v48 = vld [vmem:[%s6447_s1 + $0x224] sm:$0xf]  ;;  %v2766_v52 = vor.u32 %v4024_v40, %v2763_v41 }
  0x56   :  { %1749 = vmatpush.bf16.msra.mxu0 %v2798_v24  ;;  %v3019_v49 = vld [vmem:[%s6447_s1 + $0x230] sm:$0xf0]  ;;  %v4120_v50 = vld [vmem:[%s6447_s1 + $0x324] sm:$0xf]  ;;  %v2894_v55 = vor.u32 %v4056_v42, %v2891_v46 }
  0x57   :  { %1763 = vmatpush.bf16.msra.mxu1 %v2926_v25  ;;  %v3147_v51 = vld [vmem:[%s6447_s1 + $0x330] sm:$0xf0]  ;;  %v4020_v53 = vld [vmem:[%s6447_s1 + $0x4] sm:$0xf]  ;;  %v3022_v56 = vor.u32 %v4088_v48, %v3019_v49 }
  0x58   :  { %1777 = vmatpush.bf16.msra.mxu2 %v3054_v26  ;;  %v2747_v54 = vld [vmem:[%s6447_s1 + $0x10] sm:$0xf0]  ;;  %v4052_v57 = vld [vmem:[%s6447_s1 + $0x104] sm:$0xf]  ;;  %v3150_v61 = vor.u32 %v4120_v50, %v3147_v51 }
  0x59   :  { %1791 = vmatpush.bf16.msra.mxu3 %v3182_v30  ;;  %v2875_v59 = vld [vmem:[%s6447_s1 + $0x110] sm:$0xf0]  ;;  %v4084_v60 = vld [vmem:[%s6447_s1 + $0x204] sm:$0xf]  ;;  %v2750_v5 = vor.u32 %v4020_v53, %v2747_v54 }
  0x5a   :  { %1750 = vmatpush.bf16.msra.mxu0 %v2782_v36  ;;  %v3003_v62 = vld [vmem:[%s6447_s1 + $0x210] sm:$0xf0]  ;;  %v4116_v63 = vld [vmem:[%s6447_s1 + $0x304] sm:$0xf]  ;;  %v2878_v9 = vor.u32 %v4052_v57, %v2875_v59 }
  0x5b   :  { %1764 = vmatpush.bf16.msra.mxu1 %v2910_v37  ;;  %v3131_v0 = vld [vmem:[%s6447_s1 + $0x310] sm:$0xf0]  ;;  %v4176_v2 = vld [vmem:[%s6447_s1 + $0x4e4] sm:$0xf]  ;;  %v3006_v11 = vor.u32 %v4084_v60, %v3003_v62 }
  0x5c   :  { %1778 = vmatpush.bf16.msra.mxu2 %v3038_v38  ;;  %v3371_v3 = vld [vmem:[%s6447_s1 + $0x4f0] sm:$0xf0]  ;;  %v4208_v4 = vld [vmem:[%s6447_s1 + $0x5e4] sm:$0xf]  ;;  %v3134_v14 = vor.u32 %v4116_v63, %v3131_v0 }
  0x5d   :  { %1792 = vmatpush.bf16.msra.mxu3 %v3166_v45  ;;  %v3499_v6 = vld [vmem:[%s6447_s1 + $0x5f0] sm:$0xf0]  ;;  %v4240_v7 = vld [vmem:[%s6447_s1 + $0x6e4] sm:$0xf]  ;;  %v3374_v15 = vor.u32 %v4176_v2, %v3371_v3 }
  0x5e   :  { %1751 = vmatpush.bf16.msra.mxu0 %v2766_v52  ;;  %v3627_v8 = vld [vmem:[%s6447_s1 + $0x6f0] sm:$0xf0]  ;;  %v4272_v12 = vld [vmem:[%s6447_s1 + $0x7e4] sm:$0xf]  ;;  %v3502_v16 = vor.u32 %v4208_v4, %v3499_v6 }
  0x5f   :  { %1765 = vmatpush.bf16.msra.mxu1 %v2894_v55  ;;  %v3755_v13 = vld [vmem:[%s6447_s1 + $0x7f0] sm:$0xf0]  ;;  %v3630_v18 = vor.u32 %v4240_v7, %v3627_v8  ;;  %v4172_v19 = vld [vmem:[%s6447_s1 + $0x4c4] sm:$0xf] }
  0x60   :  { %1779 = vmatpush.bf16.msra.mxu2 %v3022_v56  ;;  %v3355_v20 = vld [vmem:[%s6447_s1 + $0x4d0] sm:$0xf0]  ;;  %v4204_v21 = vld [vmem:[%s6447_s1 + $0x5c4] sm:$0xf]  ;;  %v3758_v22 = vor.u32 %v4272_v12, %v3755_v13 }
  0x61   :  { %1793 = vmatpush.bf16.msra.mxu3 %v3150_v61  ;;  %v3483_v23 = vld [vmem:[%s6447_s1 + $0x5d0] sm:$0xf0]  ;;  %v4236_v24 = vld [vmem:[%s6447_s1 + $0x6c4] sm:$0xf]  ;;  %v3358_v28 = vor.u32 %v4172_v19, %v3355_v20 }
  0x62   :  { %1752 = vmatpush.bf16.msra.mxu0 %v2750_v5  ;;  %v3611_v25 = vld [vmem:[%s6447_s1 + $0x6d0] sm:$0xf0]  ;;  %v4268_v26 = vld [vmem:[%s6447_s1 + $0x7c4] sm:$0xf]  ;;  %v3486_v29 = vor.u32 %v4204_v21, %v3483_v23 }
  0x63   :  { %1766 = vmatpush.bf16.msra.mxu1 %v2878_v9  ;;  %v3739_v27 = vld [vmem:[%s6447_s1 + $0x7d0] sm:$0xf0]  ;;  %v3614_v30 = vor.u32 %v4236_v24, %v3611_v25  ;;  %v4168_v31 = vld [vmem:[%s6447_s1 + $0x4a4] sm:$0xf] }
  0x64   :  { %1780 = vmatpush.bf16.msra.mxu2 %v3006_v11  ;;  %v3339_v32 = vld [vmem:[%s6447_s1 + $0x4b0] sm:$0xf0]  ;;  %v4200_v33 = vld [vmem:[%s6447_s1 + $0x5a4] sm:$0xf]  ;;  %v3742_v34 = vor.u32 %v4268_v26, %v3739_v27 }
  0x65   :  { %1794 = vmatpush.bf16.msra.mxu3 %v3134_v14  ;;  %v3467_v35 = vld [vmem:[%s6447_s1 + $0x5b0] sm:$0xf0]  ;;  %v4232_v36 = vld [vmem:[%s6447_s1 + $0x6a4] sm:$0xf]  ;;  %1753 = vmatmul.bf16.vlgmr.msra.gmra.mxu0 %v4659_v58  ;;  %v3342_v41 = vor.u32 %v4168_v31, %v3339_v32 }
  0x66   :  { %1801 = vmatpush.bf16.msrb.mxu0 %v3374_v15  ;;  %v3595_v37 = vld [vmem:[%s6447_s1 + $0x6b0] sm:$0xf0]  ;;  %v4264_v38 = vld [vmem:[%s6447_s1 + $0x7a4] sm:$0xf]  ;;  %1767 = vmatmul.bf16.vlgmr.msra.gmra.mxu1 %v4695_v10  ;;  %v3470_v42 = vor.u32 %v4200_v33, %v3467_v35 }
  0x67   :  { %1815 = vmatpush.bf16.msrb.mxu1 %v3502_v16  ;;  %v3723_v40 = vld [vmem:[%s6447_s1 + $0x7b0] sm:$0xf0]  ;;  %1781 = vmatmul.bf16.vlgmr.msra.gmra.mxu2 %v4673_v1  ;;  %v3598_v45 = vor.u32 %v4232_v36, %v3595_v37  ;;  %v4164_v46 = vld [vmem:[%s6447_s1 + $0x484] sm:$0xf] }
  0x68   :  { %1829 = vmatpush.bf16.msrb.mxu2 %v3630_v18  ;;  %1795 = vmatmul.bf16.vlgmr.msra.gmra.mxu3 %v4709_v17  ;;  %v3323_v48 = vld [vmem:[%s6447_s1 + $0x490] sm:$0xf0]  ;;  %v4196_v49 = vld [vmem:[%s6447_s1 + $0x584] sm:$0xf]  ;;  %v3726_v50 = vor.u32 %v4264_v38, %v3723_v40 }
  0x69   :  { %1843 = vmatpush.bf16.msrb.mxu3 %v3758_v22  ;;  %v3451_v51 = vld [vmem:[%s6447_s1 + $0x590] sm:$0xf0]  ;;  %v4228_v52 = vld [vmem:[%s6447_s1 + $0x684] sm:$0xf]  ;;  %v3326_v56 = vor.u32 %v4164_v46, %v3323_v48  ;;  %v2865_v48 = vld [vmem:[%s6447_s1 + $0xe8] sm:$0xf] }
  0x6a   :  { %1802 = vmatpush.bf16.msrb.mxu0 %v3358_v28  ;;  %v3579_v53 = vld [vmem:[%s6447_s1 + $0x690] sm:$0xf0]  ;;  %v4260_v54 = vld [vmem:[%s6447_s1 + $0x784] sm:$0xf]  ;;  %v3454_v57 = vor.u32 %v4196_v49, %v3451_v51  ;;  %v4051_v49 = vld [vmem:[%s6447_s1 + $0xf4] sm:$0xf0] }
  0x6b   :  { %1816 = vmatpush.bf16.msrb.mxu1 %v3486_v29  ;;  %v3707_v55 = vld [vmem:[%s6447_s1 + $0x790] sm:$0xf0]  ;;  %v3582_v59 = vor.u32 %v4228_v52, %v3579_v53  ;;  %v4160_v60 = vld [vmem:[%s6447_s1 + $0x464] sm:$0xf]  ;;  %v4083_v52 = vld [vmem:[%s6447_s1 + $0x1f4] sm:$0xf0] }
  0x6c   :  { %1830 = vmatpush.bf16.msrb.mxu2 %v3614_v30  ;;  %v3307_v61 = vld [vmem:[%s6447_s1 + $0x470] sm:$0xf0]  ;;  %v4192_v62 = vld [vmem:[%s6447_s1 + $0x564] sm:$0xf]  ;;  %v3710_v63 = vor.u32 %v4260_v54, %v3707_v55  ;;  %v3121_v53 = vld [vmem:[%s6447_s1 + $0x2e8] sm:$0xf] }
  0x6d   :  { %1844 = vmatpush.bf16.msrb.mxu3 %v3742_v34  ;;  %v3435_v0 = vld [vmem:[%s6447_s1 + $0x570] sm:$0xf0]  ;;  %v4224_v2 = vld [vmem:[%s6447_s1 + $0x664] sm:$0xf]  ;;  %v3310_v6 = vor.u32 %v4160_v60, %v3307_v61  ;;  %v4115_v54 = vld [vmem:[%s6447_s1 + $0x2f4] sm:$0xf0]  ;;  %v2866_v61 = vor.u32 %v4051_v49, %v2865_v48 }
  0x6e   :  { %1803 = vmatpush.bf16.msrb.mxu0 %v3342_v41  ;;  %v3563_v3 = vld [vmem:[%s6447_s1 + $0x670] sm:$0xf0]  ;;  %v4256_v4 = vld [vmem:[%s6447_s1 + $0x764] sm:$0xf]  ;;  %v3438_v7 = vor.u32 %v4192_v62, %v3435_v0  ;;  %v2849_v0 = vld [vmem:[%s6447_s1 + $0xc8] sm:$0xf] }
  0x6f   :  { %1817 = vmatpush.bf16.msrb.mxu1 %v3470_v42  ;;  %v3691_v5 = vld [vmem:[%s6447_s1 + $0x770] sm:$0xf0]  ;;  %v3566_v8 = vor.u32 %v4224_v2, %v3563_v3  ;;  %v4156_v9 = vld [vmem:[%s6447_s1 + $0x444] sm:$0xf]  ;;  %v4047_v2 = vld [vmem:[%s6447_s1 + $0xd4] sm:$0xf0] }
  0x70   :  { %1831 = vmatpush.bf16.msrb.mxu2 %v3598_v45  ;;  %v3291_v11 = vld [vmem:[%s6447_s1 + $0x450] sm:$0xf0]  ;;  %v4188_v12 = vld [vmem:[%s6447_s1 + $0x544] sm:$0xf]  ;;  %v3694_v13 = vor.u32 %v4256_v4, %v3691_v5  ;;  %v2977_v3 = vld [vmem:[%s6447_s1 + $0x1c8] sm:$0xf] }
  0x71   :  { %1845 = vmatpush.bf16.msrb.mxu3 %v3726_v50  ;;  %v3419_v14 = vld [vmem:[%s6447_s1 + $0x550] sm:$0xf0]  ;;  %v4220_v15 = vld [vmem:[%s6447_s1 + $0x644] sm:$0xf]  ;;  %v3294_v20 = vor.u32 %v4156_v9, %v3291_v11  ;;  %v2993_v50 = vld [vmem:[%s6447_s1 + $0x1e8] sm:$0xf]  ;;  %v2850_v11 = vor.u32 %v4047_v2, %v2849_v0 }
  0x72   :  { %1804 = vmatpush.bf16.msrb.mxu0 %v3326_v56  ;;  %v3547_v16 = vld [vmem:[%s6447_s1 + $0x650] sm:$0xf0]  ;;  %v4252_v18 = vld [vmem:[%s6447_s1 + $0x744] sm:$0xf]  ;;  %v3422_v21 = vor.u32 %v4188_v12, %v3419_v14  ;;  %v2994_v62 = vor.u32 %v4083_v52, %v2993_v50  ;;  %v4079_v5 = vld [vmem:[%s6447_s1 + $0x1d4] sm:$0xf0] }
  0x73   :  { %1818 = vmatpush.bf16.msrb.mxu1 %v3454_v57  ;;  %v3675_v19 = vld [vmem:[%s6447_s1 + $0x750] sm:$0xf0]  ;;  %v3550_v22 = vor.u32 %v4220_v15, %v3547_v16  ;;  %v4152_v23 = vld [vmem:[%s6447_s1 + $0x424] sm:$0xf]  ;;  %v3249_v57 = vld [vmem:[%s6447_s1 + $0x3e8] sm:$0xf]  ;;  %v2978_v12 = vor.u32 %v4079_v5, %v2977_v3 }
  0x74   :  { %1832 = vmatpush.bf16.msrb.mxu2 %v3582_v59  ;;  %v3275_v24 = vld [vmem:[%s6447_s1 + $0x430] sm:$0xf0]  ;;  %v4184_v25 = vld [vmem:[%s6447_s1 + $0x524] sm:$0xf]  ;;  %v3678_v26 = vor.u32 %v4252_v18, %v3675_v19  ;;  %v4147_v59 = vld [vmem:[%s6447_s1 + $0x3f4] sm:$0xf0] }
  0x75   :  { %1846 = vmatpush.bf16.msrb.mxu3 %v3710_v63  ;;  %v3403_v27 = vld [vmem:[%s6447_s1 + $0x530] sm:$0xf0]  ;;  %v4216_v28 = vld [vmem:[%s6447_s1 + $0x624] sm:$0xf]  ;;  %v3278_v32 = vor.u32 %v4152_v23, %v3275_v24  ;;  %v3122_v63 = vor.u32 %v4115_v54, %v3121_v53  ;;  %v3250_v4 = vor.u32 %v4147_v59, %v3249_v57  ;;  %v4143_v9 = vld [vmem:[%s6447_s1 + $0x3d4] sm:$0xf0] }
  0x76   :  { %1805 = vmatpush.bf16.msrb.mxu0 %v3310_v6  ;;  %v3531_v29 = vld [vmem:[%s6447_s1 + $0x630] sm:$0xf0]  ;;  %v4248_v30 = vld [vmem:[%s6447_s1 + $0x724] sm:$0xf]  ;;  %v3406_v35 = vor.u32 %v4184_v25, %v3403_v27  ;;  %v3105_v6 = vld [vmem:[%s6447_s1 + $0x2c8] sm:$0xf] }
  0x77   :  { %1819 = vmatpush.bf16.msrb.mxu1 %v3438_v7  ;;  %v3659_v31 = vld [vmem:[%s6447_s1 + $0x730] sm:$0xf0]  ;;  %v4148_v33 = vld [vmem:[%s6447_s1 + $0x404] sm:$0xf]  ;;  %v3534_v36 = vor.u32 %v4216_v28, %v3531_v29  ;;  %v4111_v7 = vld [vmem:[%s6447_s1 + $0x2d4] sm:$0xf0] }
  0x78   :  { %1833 = vmatpush.bf16.msrb.mxu2 %v3566_v8  ;;  %v3259_v34 = vld [vmem:[%s6447_s1 + $0x410] sm:$0xf0]  ;;  %v4180_v37 = vld [vmem:[%s6447_s1 + $0x504] sm:$0xf]  ;;  %v3662_v41 = vor.u32 %v4248_v30, %v3659_v31  ;;  %v3233_v8 = vld [vmem:[%s6447_s1 + $0x3c8] sm:$0xf] }
  0x79   :  { %1847 = vmatpush.bf16.msrb.mxu3 %v3694_v13  ;;  %v3387_v38 = vld [vmem:[%s6447_s1 + $0x510] sm:$0xf0]  ;;  %v4212_v40 = vld [vmem:[%s6447_s1 + $0x604] sm:$0xf]  ;;  %v3262_v51 = vor.u32 %v4148_v33, %v3259_v34  ;;  %v3106_v13 = vor.u32 %v4111_v7, %v3105_v6  ;;  %v2833_v14 = vld [vmem:[%s6447_s1 + $0xa8] sm:$0xf]  ;;  %v3234_v18 = vor.u32 %v4143_v9, %v3233_v8 }
  0x7a   :  { %1806 = vmatpush.bf16.msrb.mxu0 %v3294_v20  ;;  %v3515_v42 = vld [vmem:[%s6447_s1 + $0x610] sm:$0xf0]  ;;  %v4244_v45 = vld [vmem:[%s6447_s1 + $0x704] sm:$0xf]  ;;  %v3390_v55 = vor.u32 %v4180_v37, %v3387_v38  ;;  %v4043_v15 = vld [vmem:[%s6447_s1 + $0xb4] sm:$0xf0] }
  0x7b   :  { %1820 = vmatpush.bf16.msrb.mxu1 %v3422_v21  ;;  %v3643_v46 = vld [vmem:[%s6447_s1 + $0x710] sm:$0xf0]  ;;  %v3518_v56 = vor.u32 %v4212_v40, %v3515_v42  ;;  %v2961_v16 = vld [vmem:[%s6447_s1 + $0x1a8] sm:$0xf]  ;;  %v4075_v19 = vld [vmem:[%s6447_s1 + $0x1b4] sm:$0xf0]  ;;  %v2834_v24 = vor.u32 %v4043_v15, %v2833_v14 }
  0x7c   :  { %1834 = vmatpush.bf16.msrb.mxu2 %v3550_v22  ;;  %v3646_v60 = vor.u32 %v4244_v45, %v3643_v46  ;;  %v3089_v20 = vld [vmem:[%s6447_s1 + $0x2a8] sm:$0xf]  ;;  %v4107_v21 = vld [vmem:[%s6447_s1 + $0x2b4] sm:$0xf0]  ;;  %v2962_v25 = vor.u32 %v4075_v19, %v2961_v16 }
  0x7d   :  { %1848 = vmatpush.bf16.msrb.mxu3 %v3678_v26  ;;  %v3217_v22 = vld [vmem:[%s6447_s1 + $0x3a8] sm:$0xf]  ;;  %v4139_v23 = vld [vmem:[%s6447_s1 + $0x3b4] sm:$0xf0]  ;;  %v3090_v26 = vor.u32 %v4107_v21, %v3089_v20 }
  0x7e   :  { %1807 = vmatpush.bf16.msrb.mxu0 %v3278_v32  ;;  %v2817_v27 = vld [vmem:[%s6447_s1 + $0x88] sm:$0xf]  ;;  %v4039_v28 = vld [vmem:[%s6447_s1 + $0x94] sm:$0xf0]  ;;  %v3218_v30 = vor.u32 %v4139_v23, %v3217_v22 }
  0x7f   :  { %1821 = vmatpush.bf16.msrb.mxu1 %v3406_v35  ;;  %v2945_v29 = vld [vmem:[%s6447_s1 + $0x188] sm:$0xf]  ;;  %v4071_v31 = vld [vmem:[%s6447_s1 + $0x194] sm:$0xf0] }
  0x80   :  { %1835 = vmatpush.bf16.msrb.mxu2 %v3534_v36  ;;  %v3073_v32 = vld [vmem:[%s6447_s1 + $0x288] sm:$0xf]  ;;  %v4103_v33 = vld [vmem:[%s6447_s1 + $0x294] sm:$0xf0]  ;;  %v2818_v36 = vor.u32 %v4039_v28, %v2817_v27  ;;  %v2946_v37 = vor.u32 %v4071_v31, %v2945_v29 }
  0x81   :  { %1849 = vmatpush.bf16.msrb.mxu3 %v3662_v41  ;;  %v3201_v34 = vld [vmem:[%s6447_s1 + $0x388] sm:$0xf]  ;;  %v4135_v35 = vld [vmem:[%s6447_s1 + $0x394] sm:$0xf0]  ;;  %v3074_v38 = vor.u32 %v4103_v33, %v3073_v32 }
  0x82   :  { %1808 = vmatpush.bf16.msrb.mxu0 %v3262_v51  ;;  %v2801_v40 = vld [vmem:[%s6447_s1 + $0x68] sm:$0xf]  ;;  %v4035_v41 = vld [vmem:[%s6447_s1 + $0x74] sm:$0xf0]  ;;  %v3202_v45 = vor.u32 %v4135_v35, %v3201_v34 }
  0x83   :  { %1822 = vmatpush.bf16.msrb.mxu1 %v3390_v55  ;;  %v2929_v42 = vld [vmem:[%s6447_s1 + $0x168] sm:$0xf]  ;;  %v4067_v46 = vld [vmem:[%s6447_s1 + $0x174] sm:$0xf0]  ;;  %v2802_v52 = vor.u32 %v4035_v41, %v2801_v40 }
  0x84   :  { %1836 = vmatpush.bf16.msrb.mxu2 %v3518_v56  ;;  %v3057_v48 = vld [vmem:[%s6447_s1 + $0x268] sm:$0xf]  ;;  %v4099_v49 = vld [vmem:[%s6447_s1 + $0x274] sm:$0xf0]  ;;  %v2930_v53 = vor.u32 %v4067_v46, %v2929_v42 }
  0x85   :  { %1850 = vmatpush.bf16.msrb.mxu3 %v3646_v60  ;;  %1809 = vmatmul.bf16.vlgmr.msrb.gmra.mxu0 %v4881_v39  ;;  %v3185_v50 = vld [vmem:[%s6447_s1 + $0x368] sm:$0xf]  ;;  %v4131_v51 = vld [vmem:[%s6447_s1 + $0x374] sm:$0xf0]  ;;  %v3058_v54 = vor.u32 %v4099_v49, %v3057_v48 }
  0x86   :  { %1857 = vmatpush.bf16.msra.mxu0 %v2866_v61  ;;  %1823 = vmatmul.bf16.vlgmr.msrb.gmra.mxu1 %v4894_v44  ;;  %v2785_v55 = vld [vmem:[%s6447_s1 + $0x48] sm:$0xf]  ;;  %v4031_v56 = vld [vmem:[%s6447_s1 + $0x54] sm:$0xf0]  ;;  %v3186_v59 = vor.u32 %v4131_v51, %v3185_v50 }
  0x87   :  { %1871 = vmatpush.bf16.msra.mxu1 %v2994_v62  ;;  %1837 = vmatmul.bf16.vlgmr.msrb.gmra.mxu2 %v4892_v43  ;;  %v2913_v57 = vld [vmem:[%s6447_s1 + $0x148] sm:$0xf]  ;;  %v4063_v60 = vld [vmem:[%s6447_s1 + $0x154] sm:$0xf0]  ;;  %v2786_v2 = vor.u32 %v4031_v56, %v2785_v55 }
  0x88   :  { %1885 = vmatpush.bf16.msra.mxu2 %v3122_v63  ;;  %1851 = vmatmul.bf16.vlgmr.msrb.gmra.mxu3 %v4902_v47  ;;  %v3041_v61 = vld [vmem:[%s6447_s1 + $0x248] sm:$0xf]  ;;  %v4095_v62 = vld [vmem:[%s6447_s1 + $0x254] sm:$0xf0]  ;;  %v2914_v3 = vor.u32 %v4063_v60, %v2913_v57 }
  0x89   :  { %1899 = vmatpush.bf16.msra.mxu3 %v3250_v4  ;;  %v3169_v63 = vld [vmem:[%s6447_s1 + $0x348] sm:$0xf]  ;;  %v4127_v0 = vld [vmem:[%s6447_s1 + $0x354] sm:$0xf0]  ;;  %v3042_v4 = vor.u32 %v4095_v62, %v3041_v61 }
  0x8a   :  { %1858 = vmatpush.bf16.msra.mxu0 %v2850_v11  ;;  %v2769_v5 = vld [vmem:[%s6447_s1 + $0x28] sm:$0xf]  ;;  %v4027_v6 = vld [vmem:[%s6447_s1 + $0x34] sm:$0xf0]  ;;  %v3170_v8 = vor.u32 %v4127_v0, %v3169_v63 }
  0x8b   :  { %1872 = vmatpush.bf16.msra.mxu1 %v2978_v12  ;;  %v2897_v7 = vld [vmem:[%s6447_s1 + $0x128] sm:$0xf]  ;;  %v4059_v9 = vld [vmem:[%s6447_s1 + $0x134] sm:$0xf0]  ;;  %v2770_v15 = vor.u32 %v4027_v6, %v2769_v5 }
  0x8c   :  { %1886 = vmatpush.bf16.msra.mxu2 %v3106_v13  ;;  %v3025_v11 = vld [vmem:[%s6447_s1 + $0x228] sm:$0xf]  ;;  %v4091_v12 = vld [vmem:[%s6447_s1 + $0x234] sm:$0xf0]  ;;  %v2898_v19 = vor.u32 %v4059_v9, %v2897_v7 }
  0x8d   :  { %1900 = vmatpush.bf16.msra.mxu3 %v3234_v18  ;;  %v3153_v13 = vld [vmem:[%s6447_s1 + $0x328] sm:$0xf]  ;;  %v4123_v14 = vld [vmem:[%s6447_s1 + $0x334] sm:$0xf0]  ;;  %v3026_v20 = vor.u32 %v4091_v12, %v3025_v11 }
  0x8e   :  { %1859 = vmatpush.bf16.msra.mxu0 %v2834_v24  ;;  %v2753_v16 = vld [vmem:[%s6447_s1 + $0x8] sm:$0xf]  ;;  %v4023_v18 = vld [vmem:[%s6447_s1 + $0x14] sm:$0xf0]  ;;  %v3154_v24 = vor.u32 %v4123_v14, %v3153_v13 }
  0x8f   :  { %1873 = vmatpush.bf16.msra.mxu1 %v2962_v25  ;;  %v2881_v21 = vld [vmem:[%s6447_s1 + $0x108] sm:$0xf]  ;;  %v4055_v22 = vld [vmem:[%s6447_s1 + $0x114] sm:$0xf0]  ;;  %v2754_v31 = vor.u32 %v4023_v18, %v2753_v16 }
  0x90   :  { %1887 = vmatpush.bf16.msra.mxu2 %v3090_v26  ;;  %v3009_v23 = vld [vmem:[%s6447_s1 + $0x208] sm:$0xf]  ;;  %v4087_v25 = vld [vmem:[%s6447_s1 + $0x214] sm:$0xf0]  ;;  %v2882_v35 = vor.u32 %v4055_v22, %v2881_v21 }
  0x91   :  { %1901 = vmatpush.bf16.msra.mxu3 %v3218_v30  ;;  %v3137_v26 = vld [vmem:[%s6447_s1 + $0x308] sm:$0xf]  ;;  %v4119_v27 = vld [vmem:[%s6447_s1 + $0x314] sm:$0xf0] }
  0x92   :  { %1860 = vmatpush.bf16.msra.mxu0 %v2818_v36  ;;  %v3377_v28 = vld [vmem:[%s6447_s1 + $0x4e8] sm:$0xf]  ;;  %v4179_v29 = vld [vmem:[%s6447_s1 + $0x4f4] sm:$0xf0]  ;;  %v3010_v36 = vor.u32 %v4087_v25, %v3009_v23  ;;  %v3138_v40 = vor.u32 %v4119_v27, %v3137_v26 }
  0x93   :  { %1874 = vmatpush.bf16.msra.mxu1 %v2946_v37  ;;  %v3505_v30 = vld [vmem:[%s6447_s1 + $0x5e8] sm:$0xf]  ;;  %v4211_v32 = vld [vmem:[%s6447_s1 + $0x5f4] sm:$0xf0]  ;;  %v3378_v41 = vor.u32 %v4179_v29, %v3377_v28 }
  0x94   :  { %1888 = vmatpush.bf16.msra.mxu2 %v3074_v38  ;;  %v3633_v33 = vld [vmem:[%s6447_s1 + $0x6e8] sm:$0xf]  ;;  %v4243_v34 = vld [vmem:[%s6447_s1 + $0x6f4] sm:$0xf0]  ;;  %v3506_v42 = vor.u32 %v4211_v32, %v3505_v30 }
  0x95   :  { %1902 = vmatpush.bf16.msra.mxu3 %v3202_v45  ;;  %v3761_v37 = vld [vmem:[%s6447_s1 + $0x7e8] sm:$0xf]  ;;  %v4275_v38 = vld [vmem:[%s6447_s1 + $0x7f4] sm:$0xf0]  ;;  %v3634_v45 = vor.u32 %v4243_v34, %v3633_v33 }
  0x96   :  { %1861 = vmatpush.bf16.msra.mxu0 %v2802_v52  ;;  %v3361_v46 = vld [vmem:[%s6447_s1 + $0x4c8] sm:$0xf]  ;;  %v4175_v48 = vld [vmem:[%s6447_s1 + $0x4d4] sm:$0xf0]  ;;  %v3762_v50 = vor.u32 %v4275_v38, %v3761_v37 }
  0x97   :  { %1875 = vmatpush.bf16.msra.mxu1 %v2930_v53  ;;  %v3489_v49 = vld [vmem:[%s6447_s1 + $0x5c8] sm:$0xf]  ;;  %v4207_v51 = vld [vmem:[%s6447_s1 + $0x5d4] sm:$0xf0]  ;;  %v3362_v56 = vor.u32 %v4175_v48, %v3361_v46 }
  0x98   :  { %1889 = vmatpush.bf16.msra.mxu2 %v3058_v54  ;;  %v3617_v52 = vld [vmem:[%s6447_s1 + $0x6c8] sm:$0xf]  ;;  %v4239_v53 = vld [vmem:[%s6447_s1 + $0x6d4] sm:$0xf0]  ;;  %v3490_v57 = vor.u32 %v4207_v51, %v3489_v49 }
  0x99   :  { %1903 = vmatpush.bf16.msra.mxu3 %v3186_v59  ;;  %v3745_v54 = vld [vmem:[%s6447_s1 + $0x7c8] sm:$0xf]  ;;  %v4271_v55 = vld [vmem:[%s6447_s1 + $0x7d4] sm:$0xf0]  ;;  %v3618_v59 = vor.u32 %v4239_v53, %v3617_v52 }
  0x9a   :  { %1862 = vmatpush.bf16.msra.mxu0 %v2786_v2  ;;  %v3345_v60 = vld [vmem:[%s6447_s1 + $0x4a8] sm:$0xf]  ;;  %v4171_v61 = vld [vmem:[%s6447_s1 + $0x4b4] sm:$0xf0]  ;;  %v3746_v63 = vor.u32 %v4271_v55, %v3745_v54 }
  0x9b   :  { %1876 = vmatpush.bf16.msra.mxu1 %v2914_v3  ;;  %v3473_v62 = vld [vmem:[%s6447_s1 + $0x5a8] sm:$0xf]  ;;  %v4203_v0 = vld [vmem:[%s6447_s1 + $0x5b4] sm:$0xf0]  ;;  %v3346_v6 = vor.u32 %v4171_v61, %v3345_v60 }
  0x9c   :  { %1890 = vmatpush.bf16.msra.mxu2 %v3042_v4  ;;  %v3601_v2 = vld [vmem:[%s6447_s1 + $0x6a8] sm:$0xf]  ;;  %v4235_v3 = vld [vmem:[%s6447_s1 + $0x6b4] sm:$0xf0]  ;;  %v3474_v7 = vor.u32 %v4203_v0, %v3473_v62 }
  0x9d   :  { %1904 = vmatpush.bf16.msra.mxu3 %v3170_v8  ;;  %v3729_v4 = vld [vmem:[%s6447_s1 + $0x7a8] sm:$0xf]  ;;  %v4267_v5 = vld [vmem:[%s6447_s1 + $0x7b4] sm:$0xf0]  ;;  %v3602_v8 = vor.u32 %v4235_v3, %v3601_v2 }
  0x9e   :  { %1863 = vmatpush.bf16.msra.mxu0 %v2770_v15  ;;  %v3329_v9 = vld [vmem:[%s6447_s1 + $0x488] sm:$0xf]  ;;  %v4167_v11 = vld [vmem:[%s6447_s1 + $0x494] sm:$0xf0]  ;;  %v3730_v13 = vor.u32 %v4267_v5, %v3729_v4 }
  0x9f   :  { %1877 = vmatpush.bf16.msra.mxu1 %v2898_v19  ;;  %v3457_v12 = vld [vmem:[%s6447_s1 + $0x588] sm:$0xf]  ;;  %v4199_v14 = vld [vmem:[%s6447_s1 + $0x594] sm:$0xf0] }
  0xa0   :  { %1891 = vmatpush.bf16.msra.mxu2 %v3026_v20  ;;  %v3585_v15 = vld [vmem:[%s6447_s1 + $0x688] sm:$0xf]  ;;  %v4231_v16 = vld [vmem:[%s6447_s1 + $0x694] sm:$0xf0]  ;;  %v3330_v20 = vor.u32 %v4167_v11, %v3329_v9  ;;  %v3458_v21 = vor.u32 %v4199_v14, %v3457_v12  ;;  %v4049_v11 = vld [vmem:[%s6447_s1 + $0xec] sm:$0xf] }
  0xa1   :  { %1905 = vmatpush.bf16.msra.mxu3 %v3154_v24  ;;  %v3713_v18 = vld [vmem:[%s6447_s1 + $0x788] sm:$0xf]  ;;  %v4263_v19 = vld [vmem:[%s6447_s1 + $0x794] sm:$0xf0]  ;;  %v3586_v22 = vor.u32 %v4231_v16, %v3585_v15  ;;  %v2867_v12 = vld [vmem:[%s6447_s1 + $0xf8] sm:$0xf0] }
  0xa2   :  { %1864 = vmatpush.bf16.msra.mxu0 %v2754_v31  ;;  %v3313_v23 = vld [vmem:[%s6447_s1 + $0x468] sm:$0xf]  ;;  %v4163_v24 = vld [vmem:[%s6447_s1 + $0x474] sm:$0xf0]  ;;  %v3714_v26 = vor.u32 %v4263_v19, %v3713_v18  ;;  %v2995_v15 = vld [vmem:[%s6447_s1 + $0x1f8] sm:$0xf0] }
  0xa3   :  { %1878 = vmatpush.bf16.msra.mxu1 %v2882_v35  ;;  %v3441_v25 = vld [vmem:[%s6447_s1 + $0x568] sm:$0xf]  ;;  %v4195_v27 = vld [vmem:[%s6447_s1 + $0x574] sm:$0xf0]  ;;  %v3314_v32 = vor.u32 %v4163_v24, %v3313_v23  ;;  %v4113_v16 = vld [vmem:[%s6447_s1 + $0x2ec] sm:$0xf]  ;;  %v2870_v24 = vor.u32 %v4049_v11, %v2867_v12 }
  0xa4   :  { %1892 = vmatpush.bf16.msra.mxu2 %v3010_v36  ;;  %v3569_v28 = vld [vmem:[%s6447_s1 + $0x668] sm:$0xf]  ;;  %v4227_v29 = vld [vmem:[%s6447_s1 + $0x674] sm:$0xf0]  ;;  %v3442_v33 = vor.u32 %v4195_v27, %v3441_v25  ;;  %v3123_v18 = vld [vmem:[%s6447_s1 + $0x2f8] sm:$0xf0] }
  0xa5   :  { %1906 = vmatpush.bf16.msra.mxu3 %v3138_v40  ;;  %1865 = vmatmul.bf16.vlgmr.msra.gmra.mxu0 %v4659_v58  ;;  %v3697_v30 = vld [vmem:[%s6447_s1 + $0x768] sm:$0xf]  ;;  %v4259_v31 = vld [vmem:[%s6447_s1 + $0x774] sm:$0xf0]  ;;  %v3570_v34 = vor.u32 %v4227_v29, %v3569_v28  ;;  %v4045_v27 = vld [vmem:[%s6447_s1 + $0xcc] sm:$0xf] }
  0xa6   :  { %1913 = vmatpush.bf16.msrb.mxu0 %v3378_v41  ;;  %1879 = vmatmul.bf16.vlgmr.msra.gmra.mxu1 %v4695_v10  ;;  %v3297_v35 = vld [vmem:[%s6447_s1 + $0x448] sm:$0xf]  ;;  %v4159_v36 = vld [vmem:[%s6447_s1 + $0x454] sm:$0xf0]  ;;  %v3698_v38 = vor.u32 %v4259_v31, %v3697_v30  ;;  %v2851_v28 = vld [vmem:[%s6447_s1 + $0xd8] sm:$0xf0] }
  0xa7   :  { %1927 = vmatpush.bf16.msrb.mxu1 %v3506_v42  ;;  %1893 = vmatmul.bf16.vlgmr.msra.gmra.mxu2 %v4673_v1  ;;  %v3425_v37 = vld [vmem:[%s6447_s1 + $0x548] sm:$0xf]  ;;  %v4191_v40 = vld [vmem:[%s6447_s1 + $0x554] sm:$0xf0]  ;;  %v3298_v48 = vor.u32 %v4159_v36, %v3297_v35  ;;  %v4077_v29 = vld [vmem:[%s6447_s1 + $0x1cc] sm:$0xf]  ;;  %v2854_v36 = vor.u32 %v4045_v27, %v2851_v28 }
  0xa8   :  { %1941 = vmatpush.bf16.msrb.mxu2 %v3634_v45  ;;  %1907 = vmatmul.bf16.vlgmr.msra.gmra.mxu3 %v4709_v17  ;;  %v3553_v41 = vld [vmem:[%s6447_s1 + $0x648] sm:$0xf]  ;;  %v4223_v42 = vld [vmem:[%s6447_s1 + $0x654] sm:$0xf0]  ;;  %v3426_v49 = vor.u32 %v4191_v40, %v3425_v37  ;;  %v2979_v31 = vld [vmem:[%s6447_s1 + $0x1d8] sm:$0xf0] }
  0xa9   :  { %1955 = vmatpush.bf16.msrb.mxu3 %v3762_v50  ;;  %v3681_v45 = vld [vmem:[%s6447_s1 + $0x748] sm:$0xf]  ;;  %v4255_v46 = vld [vmem:[%s6447_s1 + $0x754] sm:$0xf0]  ;;  %v3554_v50 = vor.u32 %v4223_v42, %v3553_v41  ;;  %v3235_v35 = vld [vmem:[%s6447_s1 + $0x3d8] sm:$0xf0]  ;;  %v2982_v37 = vor.u32 %v4077_v29, %v2979_v31 }
  0xaa   :  { %1914 = vmatpush.bf16.msrb.mxu0 %v3362_v56  ;;  %v3281_v51 = vld [vmem:[%s6447_s1 + $0x428] sm:$0xf]  ;;  %v4155_v52 = vld [vmem:[%s6447_s1 + $0x434] sm:$0xf0]  ;;  %v3682_v54 = vor.u32 %v4255_v46, %v3681_v45  ;;  %v4041_v40 = vld [vmem:[%s6447_s1 + $0xac] sm:$0xf] }
  0xab   :  { %1928 = vmatpush.bf16.msrb.mxu1 %v3490_v57  ;;  %v3409_v53 = vld [vmem:[%s6447_s1 + $0x528] sm:$0xf]  ;;  %v4187_v55 = vld [vmem:[%s6447_s1 + $0x534] sm:$0xf0]  ;;  %v3282_v61 = vor.u32 %v4155_v52, %v3281_v51  ;;  %v2835_v41 = vld [vmem:[%s6447_s1 + $0xb8] sm:$0xf0] }
  0xac   :  { %1942 = vmatpush.bf16.msrb.mxu2 %v3618_v59  ;;  %v3537_v56 = vld [vmem:[%s6447_s1 + $0x628] sm:$0xf]  ;;  %v4219_v57 = vld [vmem:[%s6447_s1 + $0x634] sm:$0xf0]  ;;  %v3410_v0 = vor.u32 %v4187_v55, %v3409_v53  ;;  %v4073_v42 = vld [vmem:[%s6447_s1 + $0x1ac] sm:$0xf]  ;;  %v2838_v52 = vor.u32 %v4041_v40, %v2835_v41 }
  0xad   :  { %1956 = vmatpush.bf16.msrb.mxu3 %v3746_v63  ;;  %v3665_v59 = vld [vmem:[%s6447_s1 + $0x728] sm:$0xf]  ;;  %v4251_v60 = vld [vmem:[%s6447_s1 + $0x734] sm:$0xf0]  ;;  %v3538_v2 = vor.u32 %v4219_v57, %v3537_v56  ;;  %v2963_v46 = vld [vmem:[%s6447_s1 + $0x1b8] sm:$0xf0] }
  0xae   :  { %1915 = vmatpush.bf16.msrb.mxu0 %v3346_v6  ;;  %v3265_v62 = vld [vmem:[%s6447_s1 + $0x408] sm:$0xf]  ;;  %v4151_v63 = vld [vmem:[%s6447_s1 + $0x414] sm:$0xf0]  ;;  %v3666_v6 = vor.u32 %v4251_v60, %v3665_v59  ;;  %v3219_v51 = vld [vmem:[%s6447_s1 + $0x3b8] sm:$0xf0]  ;;  %v2966_v53 = vor.u32 %v4073_v42, %v2963_v46 }
  0xaf   :  { %1929 = vmatpush.bf16.msrb.mxu1 %v3474_v7  ;;  %v3393_v3 = vld [vmem:[%s6447_s1 + $0x508] sm:$0xf]  ;;  %v4183_v4 = vld [vmem:[%s6447_s1 + $0x514] sm:$0xf0]  ;;  %v3266_v14 = vor.u32 %v4151_v63, %v3265_v62  ;;  %v4037_v55 = vld [vmem:[%s6447_s1 + $0x8c] sm:$0xf] }
  0xb0   :  { %1943 = vmatpush.bf16.msrb.mxu2 %v3602_v8  ;;  %v3521_v5 = vld [vmem:[%s6447_s1 + $0x608] sm:$0xf]  ;;  %v4215_v7 = vld [vmem:[%s6447_s1 + $0x614] sm:$0xf0]  ;;  %v3394_v19 = vor.u32 %v4183_v4, %v3393_v3  ;;  %v2819_v56 = vld [vmem:[%s6447_s1 + $0x98] sm:$0xf0]  ;;  %v5740_v3 = vpop.f32.mrf.mxu0 }
  0xb1   :  { %1957 = vmatpush.bf16.msrb.mxu3 %v3730_v13  ;;  %v3649_v8 = vld [vmem:[%s6447_s1 + $0x708] sm:$0xf]  ;;  %v4247_v9 = vld [vmem:[%s6447_s1 + $0x714] sm:$0xf0]  ;;  %v4081_v13 = vld [vmem:[%s6447_s1 + $0x1ec] sm:$0xf] }
  0xb2   :  { %1916 = vmatpush.bf16.msrb.mxu0 %v3330_v20  ;;  %v3522_v20 = vor.u32 %v4215_v7, %v3521_v5  ;;  %v3650_v23 = vor.u32 %v4247_v9, %v3649_v8  ;;  %v2998_v25 = vor.u32 %v4081_v13, %v2995_v15  ;;  %v4069_v57 = vld [vmem:[%s6447_s1 + $0x18c] sm:$0xf]  ;;  %v2947_v60 = vld [vmem:[%s6447_s1 + $0x198] sm:$0xf0]  ;;  %v5751_v9 = vpop.f32.mrf.mxu1 }
  0xb3   :  { %1930 = vmatpush.bf16.msrb.mxu1 %v3458_v21  ;;  %v4145_v21 = vld [vmem:[%s6447_s1 + $0x3ec] sm:$0xf]  ;;  %v3075_v62 = vld [vmem:[%s6447_s1 + $0x298] sm:$0xf0]  ;;  %v2950_v4 = vor.u32 %v4069_v57, %v2947_v60 }
  0xb4   :  { %1944 = vmatpush.bf16.msrb.mxu2 %v3586_v22  ;;  %v3251_v22 = vld [vmem:[%s6447_s1 + $0x3f8] sm:$0xf0]  ;;  %v4133_v63 = vld [vmem:[%s6447_s1 + $0x38c] sm:$0xf] }
  0xb5   :  { %1958 = vmatpush.bf16.msrb.mxu3 %v3714_v26  ;;  %v3126_v26 = vor.u32 %v4113_v16, %v3123_v18  ;;  %v3254_v30 = vor.u32 %v4145_v21, %v3251_v22  ;;  %v2803_v7 = vld [vmem:[%s6447_s1 + $0x78] sm:$0xf0]  ;;  %v4065_v8 = vld [vmem:[%s6447_s1 + $0x16c] sm:$0xf] }
  0xb6   :  { %1917 = vmatpush.bf16.msrb.mxu0 %v3314_v32  ;;  %v4109_v32 = vld [vmem:[%s6447_s1 + $0x2cc] sm:$0xf]  ;;  %v2931_v12 = vld [vmem:[%s6447_s1 + $0x178] sm:$0xf0] }
  0xb7   :  { %1931 = vmatpush.bf16.msrb.mxu1 %v3442_v33  ;;  %v3107_v33 = vld [vmem:[%s6447_s1 + $0x2d8] sm:$0xf0]  ;;  %v4097_v13 = vld [vmem:[%s6447_s1 + $0x26c] sm:$0xf] }
  0xb8   :  { %1945 = vmatpush.bf16.msrb.mxu2 %v3570_v34  ;;  %v4141_v34 = vld [vmem:[%s6447_s1 + $0x3cc] sm:$0xf]  ;;  %v3187_v16 = vld [vmem:[%s6447_s1 + $0x378] sm:$0xf0] }
  0xb9   :  { %1959 = vmatpush.bf16.msrb.mxu3 %v3698_v38  ;;  %v3110_v38 = vor.u32 %v4109_v32, %v3107_v33  ;;  %v3238_v45 = vor.u32 %v4141_v34, %v3235_v35  ;;  %v4129_v15 = vld [vmem:[%s6447_s1 + $0x36c] sm:$0xf]  ;;  %v2787_v22 = vld [vmem:[%s6447_s1 + $0x58] sm:$0xf0]  ;;  %v5794_v32 = vpop.f32.mrf.mxu3 }
  0xba   :  { %1918 = vmatpush.bf16.msrb.mxu0 %v3298_v48  ;;  %v4105_v48 = vld [vmem:[%s6447_s1 + $0x2ac] sm:$0xf]  ;;  %v3043_v27 = vld [vmem:[%s6447_s1 + $0x258] sm:$0xf0] }
  0xbb   :  { %1932 = vmatpush.bf16.msrb.mxu1 %v3426_v49  ;;  %v3091_v49 = vld [vmem:[%s6447_s1 + $0x2b8] sm:$0xf0]  ;;  %v4029_v21 = vld [vmem:[%s6447_s1 + $0x4c] sm:$0xf] }
  0xbc   :  { %1946 = vmatpush.bf16.msrb.mxu2 %v3554_v50  ;;  %v4137_v50 = vld [vmem:[%s6447_s1 + $0x3ac] sm:$0xf]  ;;  %v3171_v29 = vld [vmem:[%s6447_s1 + $0x358] sm:$0xf0]  ;;  %v2790_v31 = vor.u32 %v4029_v21, %v2787_v22 }
  0xbd   :  { %1960 = vmatpush.bf16.msrb.mxu3 %v3682_v54  ;;  %v3094_v54 = vor.u32 %v4105_v48, %v3091_v49  ;;  %v3222_v59 = vor.u32 %v4137_v50, %v3219_v51  ;;  %v4125_v28 = vld [vmem:[%s6447_s1 + $0x34c] sm:$0xf]  ;;  %v2899_v40 = vld [vmem:[%s6447_s1 + $0x138] sm:$0xf0]  ;;  %v5822_v49 = vpop.f32.mrf.mxu1 }
  0xbe   :  { %1919 = vmatpush.bf16.msrb.mxu0 %v3282_v61  ;;  %v4101_v61 = vld [vmem:[%s6447_s1 + $0x28c] sm:$0xf]  ;;  %v3027_v42 = vld [vmem:[%s6447_s1 + $0x238] sm:$0xf0] }
  0xbf   :  { %1933 = vmatpush.bf16.msrb.mxu1 %v3410_v0  ;;  %v3203_v0 = vld [vmem:[%s6447_s1 + $0x398] sm:$0xf0]  ;;  %v3078_v5 = vor.u32 %v4101_v61, %v3075_v62  ;;  %v4025_v35 = vld [vmem:[%s6447_s1 + $0x2c] sm:$0xf] }
  0xc0   :  { %1947 = vmatpush.bf16.msrb.mxu2 %v3538_v2  ;;  %v2822_v2 = vor.u32 %v4037_v55, %v2819_v56  ;;  %v3206_v11 = vor.u32 %v4133_v63, %v3203_v0  ;;  %v4089_v41 = vld [vmem:[%s6447_s1 + $0x22c] sm:$0xf]  ;;  %v3155_v48 = vld [vmem:[%s6447_s1 + $0x338] sm:$0xf0] }
  0xc1   :  { %1961 = vmatpush.bf16.msrb.mxu3 %v3666_v6  ;;  %v4033_v6 = vld [vmem:[%s6447_s1 + $0x6c] sm:$0xf]  ;;  %v2883_v56 = vld [vmem:[%s6447_s1 + $0x118] sm:$0xf0] }
  0xc2   :  { %1920 = vmatpush.bf16.msrb.mxu0 %v3266_v14  ;;  %v3059_v14 = vld [vmem:[%s6447_s1 + $0x278] sm:$0xf0]  ;;  %v2806_v18 = vor.u32 %v4033_v6, %v2803_v7  ;;  %v4121_v46 = vld [vmem:[%s6447_s1 + $0x32c] sm:$0xf] }
  0xc3   :  { %1934 = vmatpush.bf16.msrb.mxu1 %v3394_v19  ;;  %v2934_v19 = vor.u32 %v4065_v8, %v2931_v12  ;;  %v4021_v51 = vld [vmem:[%s6447_s1 + $0xc] sm:$0xf]  ;;  %v3011_v60 = vld [vmem:[%s6447_s1 + $0x218] sm:$0xf0] }
  0xc4   :  { %1948 = vmatpush.bf16.msrb.mxu2 %v3522_v20  ;;  %v3062_v20 = vor.u32 %v4097_v13, %v3059_v14  ;;  %v4053_v55 = vld [vmem:[%s6447_s1 + $0x10c] sm:$0xf]  ;;  %v3139_v62 = vld [vmem:[%s6447_s1 + $0x318] sm:$0xf0] }
  0xc5   :  { %1962 = vmatpush.bf16.msrb.mxu3 %v3650_v23  ;;  %1921 = vmatmul.bf16.vlgmr.msrb.gmra.mxu0 %v4881_v39  ;;  %v4061_v23 = vld [vmem:[%s6447_s1 + $0x14c] sm:$0xf]  ;;  %v3379_v0 = vld [vmem:[%s6447_s1 + $0x4f8] sm:$0xf0]  ;;  %v2886_v8 = vor.u32 %v4053_v55, %v2883_v56 }
  0xc6   :  { %1969 = vmatpush.bf16.msra.mxu0 %v2870_v24  ;;  %1935 = vmatmul.bf16.vlgmr.msrb.gmra.mxu1 %v4894_v44  ;;  %v3190_v24 = vor.u32 %v4129_v15, %v3187_v16  ;;  %v4085_v57 = vld [vmem:[%s6447_s1 + $0x20c] sm:$0xf]  ;;  %v3635_v7 = vld [vmem:[%s6447_s1 + $0x6f8] sm:$0xf0] }
  0xc7   :  { %1983 = vmatpush.bf16.msra.mxu1 %v2998_v25  ;;  %1949 = vmatmul.bf16.vlgmr.msrb.gmra.mxu2 %v4892_v43  ;;  %v2915_v25 = vld [vmem:[%s6447_s1 + $0x158] sm:$0xf0]  ;;  %v4117_v61 = vld [vmem:[%s6447_s1 + $0x30c] sm:$0xf] }
  0xc8   :  { %1997 = vmatpush.bf16.msra.mxu2 %v3126_v26  ;;  %1963 = vmatmul.bf16.vlgmr.msrb.gmra.mxu3 %v4902_v47  ;;  %v4093_v26 = vld [vmem:[%s6447_s1 + $0x24c] sm:$0xf]  ;;  %v2918_v33 = vor.u32 %v4061_v23, %v2915_v25  ;;  %v3763_v13 = vld [vmem:[%s6447_s1 + $0x7f8] sm:$0xf0]  ;;  %v3142_v15 = vor.u32 %v4117_v61, %v3139_v62 }
  0xc9   :  { %2011 = vmatpush.bf16.msra.mxu3 %v3254_v30  ;;  %v5792_v30 = vpop.f32.mrf.mxu2  ;;  %v3046_v34 = vor.u32 %v4093_v26, %v3043_v27  ;;  %v4177_v63 = vld [vmem:[%s6447_s1 + $0x4ec] sm:$0xf]  ;;  %v3363_v22 = vld [vmem:[%s6447_s1 + $0x4d8] sm:$0xf0] }
  0xca   :  { %1970 = vmatpush.bf16.msra.mxu0 %v2854_v36  ;;  %v2771_v36 = vld [vmem:[%s6447_s1 + $0x38] sm:$0xf0]  ;;  %v4241_v6 = vld [vmem:[%s6447_s1 + $0x6ec] sm:$0xf]  ;;  %v3382_v16 = vor.u32 %v4177_v63, %v3379_v0 }
  0xcb   :  { %1984 = vmatpush.bf16.msra.mxu1 %v2982_v37  ;;  %v4057_v37 = vld [vmem:[%s6447_s1 + $0x12c] sm:$0xf]  ;;  %v2774_v50 = vor.u32 %v4025_v35, %v2771_v36  ;;  %v3491_v25 = vld [vmem:[%s6447_s1 + $0x5d8] sm:$0xf0] }
  0xcc   :  { %1998 = vmatpush.bf16.msra.mxu2 %v3110_v38  ;;  %v3174_v38 = vor.u32 %v4125_v28, %v3171_v29  ;;  %v4273_v12 = vld [vmem:[%s6447_s1 + $0x7ec] sm:$0xf]  ;;  %v3619_v27 = vld [vmem:[%s6447_s1 + $0x6d8] sm:$0xf0] }
  0xcd   :  { %2012 = vmatpush.bf16.msra.mxu3 %v3238_v45  ;;  %v5814_v45 = vpop.f32.mrf.mxu0  ;;  %v4173_v21 = vld [vmem:[%s6447_s1 + $0x4cc] sm:$0xf]  ;;  %v3331_v55 = vld [vmem:[%s6447_s1 + $0x498] sm:$0xf0] }
  0xce   :  { %1971 = vmatpush.bf16.msra.mxu0 %v2838_v52  ;;  %v2755_v52 = vld [vmem:[%s6447_s1 + $0x18] sm:$0xf0]  ;;  %v4205_v23 = vld [vmem:[%s6447_s1 + $0x5cc] sm:$0xf] }
  0xcf   :  { %1985 = vmatpush.bf16.msra.mxu1 %v2966_v53  ;;  %v2902_v53 = vor.u32 %v4057_v37, %v2899_v40  ;;  %v4237_v26 = vld [vmem:[%s6447_s1 + $0x6cc] sm:$0xf]  ;;  %v3494_v35 = vor.u32 %v4205_v23, %v3491_v25  ;;  %v3459_v56 = vld [vmem:[%s6447_s1 + $0x598] sm:$0xf0] }
  0xd0   :  { %1999 = vmatpush.bf16.msra.mxu2 %v3094_v54  ;;  %v3030_v54 = vor.u32 %v4089_v41, %v3027_v42  ;;  %v4269_v29 = vld [vmem:[%s6447_s1 + $0x7cc] sm:$0xf]  ;;  %v3622_v36 = vor.u32 %v4237_v26, %v3619_v27  ;;  %v3475_v42 = vld [vmem:[%s6447_s1 + $0x5b8] sm:$0xf0] }
  0xd1   :  { %2013 = vmatpush.bf16.msra.mxu3 %v3222_v59  ;;  %v3158_v59 = vor.u32 %v4121_v46, %v3155_v48  ;;  %v5872_v14 = vpop.f32.mrf.mxu2  ;;  %v4169_v37 = vld [vmem:[%s6447_s1 + $0x4ac] sm:$0xf]  ;;  %v3603_v48 = vld [vmem:[%s6447_s1 + $0x6b8] sm:$0xf0] }
  0xd2   :  { %1972 = vmatpush.bf16.msra.mxu0 %v2822_v2  ;;  %v4209_v2 = vld [vmem:[%s6447_s1 + $0x5ec] sm:$0xf]  ;;  %v3715_v62 = vld [vmem:[%s6447_s1 + $0x798] sm:$0xf0] }
  0xd3   :  { %1986 = vmatpush.bf16.msra.mxu1 %v2950_v4  ;;  %v2758_v4 = vor.u32 %v4021_v51, %v2755_v52  ;;  %v4201_v40 = vld [vmem:[%s6447_s1 + $0x5ac] sm:$0xf]  ;;  %v3427_v27 = vld [vmem:[%s6447_s1 + $0x558] sm:$0xf0] }
  0xd4   :  { %2000 = vmatpush.bf16.msra.mxu2 %v3078_v5  ;;  %v3507_v5 = vld [vmem:[%s6447_s1 + $0x5f8] sm:$0xf0]  ;;  %v4233_v46 = vld [vmem:[%s6447_s1 + $0x6ac] sm:$0xf]  ;;  %v3478_v52 = vor.u32 %v4201_v40, %v3475_v42 }
  0xd5   :  { %2014 = vmatpush.bf16.msra.mxu3 %v3206_v11  ;;  %v3014_v11 = vor.u32 %v4085_v57, %v3011_v60  ;;  %v5894_v28 = vpop.f32.mrf.mxu0  ;;  %v4229_v57 = vld [vmem:[%s6447_s1 + $0x68c] sm:$0xf] }
  0xd6   :  { %1973 = vmatpush.bf16.msra.mxu0 %v2806_v18  ;;  %v5874_v18 = vpop.f32.mrf.mxu3  ;;  %v4261_v61 = vld [vmem:[%s6447_s1 + $0x78c] sm:$0xf] }
  0xd7   :  { %1987 = vmatpush.bf16.msra.mxu1 %v2934_v19  ;;  %v3510_v19 = vor.u32 %v4209_v2, %v3507_v5  ;;  %v4161_v5 = vld [vmem:[%s6447_s1 + $0x46c] sm:$0xf] }
  0xd8   :  { %2001 = vmatpush.bf16.msra.mxu2 %v3062_v20  ;;  %v3638_v20 = vor.u32 %v4241_v6, %v3635_v7  ;;  %v3315_v6 = vld [vmem:[%s6447_s1 + $0x478] sm:$0xf0]  ;;  %v4193_v7 = vld [vmem:[%s6447_s1 + $0x56c] sm:$0xf] }
  0xd9   :  { %2015 = vmatpush.bf16.msra.mxu3 %v3190_v24  ;;  %v3766_v24 = vor.u32 %v4273_v12, %v3763_v13  ;;  %v3443_v12 = vld [vmem:[%s6447_s1 + $0x578] sm:$0xf0]  ;;  %v4225_v13 = vld [vmem:[%s6447_s1 + $0x66c] sm:$0xf] }
  0xda   :  { %1974 = vmatpush.bf16.msra.mxu0 %v2790_v31  ;;  %v3747_v31 = vld [vmem:[%s6447_s1 + $0x7d8] sm:$0xf0]  ;;  %v4157_v23 = vld [vmem:[%s6447_s1 + $0x44c] sm:$0xf] }
  0xdb   :  { %1988 = vmatpush.bf16.msra.mxu1 %v2918_v33  ;;  %v5902_v33 = vpop.f32.mrf.mxu1  ;;  %v3750_v41 = vor.u32 %v4269_v29, %v3747_v31  ;;  %v4189_v25 = vld [vmem:[%s6447_s1 + $0x54c] sm:$0xf]  ;;  %v3555_v31 = vld [vmem:[%s6447_s1 + $0x658] sm:$0xf0] }
  0xdc   :  { %2002 = vmatpush.bf16.msra.mxu2 %v3046_v34  ;;  %v3366_v34 = vor.u32 %v4173_v21, %v3363_v22  ;;  %v3446_v21 = vor.u32 %v4193_v7, %v3443_v12  ;;  %v4221_v29 = vld [vmem:[%s6447_s1 + $0x64c] sm:$0xf] }
  0xdd   :  { %2016 = vmatpush.bf16.msra.mxu3 %v3174_v38  ;;  %v3347_v38 = vld [vmem:[%s6447_s1 + $0x4b8] sm:$0xf0]  ;;  %v5960_v0 = vpop.f32.mrf.mxu0  ;;  %v3558_v42 = vor.u32 %v4221_v29, %v3555_v31  ;;  %v4213_v7 = vld [vmem:[%s6447_s1 + $0x60c] sm:$0xf] }
  0xde   :  { %1975 = vmatpush.bf16.msra.mxu0 %v2774_v50  ;;  %v4265_v50 = vld [vmem:[%s6447_s1 + $0x7ac] sm:$0xf]  ;;  %v3350_v51 = vor.u32 %v4169_v37, %v3347_v38  ;;  %v5952_v60 = vpop.f32.mrf.mxu3 }
  0xdf   :  { %1989 = vmatpush.bf16.msra.mxu1 %v2902_v53  ;;  %v3606_v53 = vor.u32 %v4233_v46, %v3603_v48  ;;  %v4153_v48 = vld [vmem:[%s6447_s1 + $0x42c] sm:$0xf] }
  0xe0   :  { %2003 = vmatpush.bf16.msra.mxu2 %v3030_v54  ;;  %v4165_v54 = vld [vmem:[%s6447_s1 + $0x48c] sm:$0xf] }
  0xe1   :  { %2017 = vmatpush.bf16.msra.mxu3 %v3158_v59  ;;  %v3587_v59 = vld [vmem:[%s6447_s1 + $0x698] sm:$0xf0]  ;;  %v3334_v63 = vor.u32 %v4165_v54, %v3331_v55  ;;  %v4245_v12 = vld [vmem:[%s6447_s1 + $0x70c] sm:$0xf] }
  0xe2   :  { %1976 = vmatpush.bf16.msra.mxu0 %v2758_v4  ;;  %v3590_v4 = vor.u32 %v4229_v57, %v3587_v59  ;;  %v3539_v54 = vld [vmem:[%s6447_s1 + $0x638] sm:$0xf0] }
  0xe3   :  { %1990 = vmatpush.bf16.msra.mxu1 %v2886_v8  ;;  %v5971_v8 = vpop.f32.mrf.mxu1 }
  0xe4   :  { %2004 = vmatpush.bf16.msra.mxu2 %v3014_v11  ;;  %v3718_v11 = vor.u32 %v4261_v61, %v3715_v62  ;;  %v4149_v61 = vld [vmem:[%s6447_s1 + $0x40c] sm:$0xf] }
  0xe5   :  { %2018 = vmatpush.bf16.msra.mxu3 %v3142_v15  ;;  %1977 = vmatmul.bf16.vlgmr.msra.gmra.mxu0 %v4659_v58  ;;  %v4197_v58 = vld [vmem:[%s6447_s1 + $0x58c] sm:$0xf]  ;;  %v3571_v15 = vld [vmem:[%s6447_s1 + $0x678] sm:$0xf0]  ;;  %v1754_v46 = vpop.f32.mrf.mxu0 }
  0xe6   :  { %2025 = vmatpush.bf16.msrb.mxu0 %v3382_v16  ;;  %1991 = vmatmul.bf16.vlgmr.msra.gmra.mxu1 %v4695_v10  ;;  %v3462_v2 = vor.u32 %v4197_v58, %v3459_v56  ;;  %v4257_v16 = vld [vmem:[%s6447_s1 + $0x76c] sm:$0xf]  ;;  %v3574_v22 = vor.u32 %v4225_v13, %v3571_v15  ;;  %v6019_v40 = vpop.f32.mrf.mxu3  ;;  %v3651_v13 = vld [vmem:[%s6447_s1 + $0x718] sm:$0xf0]  ;;  %v3825_v15 = vld [vmem:[%s6450_s3 + $0x70] sm:$0xf] }
  0xe7   :  { %2039 = vmatpush.bf16.msrb.mxu1 %v3510_v19  ;;  %2005 = vmatmul.bf16.vlgmr.msra.gmra.mxu2 %v4673_v1  ;;  %v3731_v1 = vld [vmem:[%s6447_s1 + $0x7b8] sm:$0xf0]  ;;  %v4249_v58 = vld [vmem:[%s6447_s1 + $0x72c] sm:$0xf] }
  0xe8   :  { %2053 = vmatpush.bf16.msrb.mxu2 %v3638_v20  ;;  %2019 = vmatmul.bf16.vlgmr.msra.gmra.mxu3 %v4709_v17  ;;  %v5941_v17 = vpop.f32.mrf.mxu2  ;;  %v3734_v10 = vor.u32 %v4265_v50, %v3731_v1  ;;  %v3699_v19 = vld [vmem:[%s6447_s1 + $0x778] sm:$0xf0]  ;;  %v3318_v20 = vor.u32 %v4161_v5, %v3315_v6  ;;  %v4185_v1 = vld [vmem:[%s6447_s1 + $0x52c] sm:$0xf] }
  0xe9   :  { %2067 = vmatpush.bf16.msrb.mxu3 %v3766_v24  ;;  %v3299_v24 = vld [vmem:[%s6447_s1 + $0x458] sm:$0xf0]  ;;  %v3702_v26 = vor.u32 %v4257_v16, %v3699_v19  ;;  %v4291_v16 = vld [vmem:[%s6450_s3 + $0x74] sm:$0xf0] }
  0xea   :  { %2026 = vmatpush.bf16.msrb.mxu0 %v3366_v34  ;;  %v4253_v34 = vld [vmem:[%s6447_s1 + $0x74c] sm:$0xf]  ;;  %v3302_v38 = vor.u32 %v4157_v23, %v3299_v24  ;;  %v3283_v50 = vld [vmem:[%s6447_s1 + $0x438] sm:$0xf0]  ;;  %v3889_v23 = vld [vmem:[%s6450_s3 + $0xf0] sm:$0xf] }
  0xeb   :  { %2040 = vmatpush.bf16.msrb.mxu1 %v3494_v35  ;;  %v3683_v35 = vld [vmem:[%s6447_s1 + $0x758] sm:$0xf0]  ;;  %v1768_v55 = vpop.f32.mrf.mxu1  ;;  %v3286_v59 = vor.u32 %v4153_v48, %v3283_v50  ;;  %v4307_v24 = vld [vmem:[%s6450_s3 + $0xf4] sm:$0xf0]  ;;  %v3881_v48 = vld [vmem:[%s6450_s3 + $0xe0] sm:$0xf] }
  0xec   :  { %2054 = vmatpush.bf16.msrb.mxu2 %v3622_v36  ;;  %v6015_v36 = vld [vmem:[%s6449_s2] sm:$0xf]  ;;  %v3395_v5 = vld [vmem:[%s6447_s1 + $0x518] sm:$0xf0]  ;;  %v4305_v50 = vld [vmem:[%s6450_s3 + $0xe4] sm:$0xf0] }
  0xed   :  { %2068 = vmatpush.bf16.msrb.mxu3 %v3750_v41  ;;  %v3430_v41 = vor.u32 %v4189_v25, %v3427_v27  ;;  %v305_v56 = vperm.slane %v6015_v36, 0  ;;  %v306_v57 = vperm.slane %v6015_v36, 1  ;;  %v1756_v31 = vpop.f32.mrf.mxu0 }
  0xee   :  { %2027 = vmatpush.bf16.msrb.mxu0 %v3350_v51  ;;  %v3686_v51 = vor.u32 %v4253_v34, %v3683_v35  ;;  %v1796_v29 = vpop.f32.mrf.mxu3  ;;  %v3890_v34 = vor.u32 %v4307_v24, %v3889_v23  ;;  %v3817_v35 = vld [vmem:[%s6450_s3 + $0x60] sm:$0xf] }
  0xef   :  { %2041 = vmatpush.bf16.msrb.mxu1 %v3478_v52  ;;  %v3411_v52 = vld [vmem:[%s6447_s1 + $0x538] sm:$0xf0]  ;;  %v1643_v19 = vadd.f32 %v5740_v3, %v305_v56  ;;  %v1755_v25 = vadd.f32 %v1754_v46, %v306_v57  ;;  %v3654_v3 = vor.u32 %v4245_v12, %v3651_v13 }
  0xf0   :  { %2055 = vmatpush.bf16.msrb.mxu2 %v3606_v53  ;;  %v6017_v37 = vpop.f32.mrf.mxu2  ;;  %v4217_v53 = vld [vmem:[%s6447_s1 + $0x62c] sm:$0xf]  ;;  %v3414_v62 = vor.u32 %v4185_v1, %v3411_v52  ;;  %v3809_v52 = vld [vmem:[%s6450_s3 + $0x50] sm:$0xf] }
  0xf1   :  { %2069 = vmatpush.bf16.msrb.mxu3 %v3734_v10  ;;  %v3667_v10 = vld [vmem:[%s6447_s1 + $0x738] sm:$0xf0]  ;;  %v1769_v1 = vadd.f32 %v1768_v55, %v1755_v25 }
  0xf2   :  { %2028 = vmatpush.bf16.msrb.mxu0 %v3334_v63  ;;  %v3542_v63 = vor.u32 %v4217_v53, %v3539_v54  ;;  %v3670_v6 = vor.u32 %v4249_v58, %v3667_v10  ;;  %v4287_v53 = vld [vmem:[%s6450_s3 + $0x54] sm:$0xf0] }
  0xf3   :  { %2042 = vmatpush.bf16.msrb.mxu1 %v3462_v2  ;;  %v3267_v2 = vld [vmem:[%s6447_s1 + $0x418] sm:$0xf0]  ;;  %v1770_v46 = vpop.f32.mrf.mxu1  ;;  %v4303_v58 = vld [vmem:[%s6450_s3 + $0xd4] sm:$0xf0] }
  0xf4   :  { %2056 = vmatpush.bf16.msrb.mxu2 %v3590_v4  ;;  %v4181_v4 = vld [vmem:[%s6447_s1 + $0x50c] sm:$0xf] }
  0xf5   :  { %2070 = vmatpush.bf16.msrb.mxu3 %v3718_v11  ;;  %v3523_v11 = vld [vmem:[%s6447_s1 + $0x618] sm:$0xf0] }
  0xf6   :  { %2029 = vmatpush.bf16.msrb.mxu0 %v3318_v20  ;;  %v1645_v20 = vadd.f32 %v5814_v45, %v305_v56  ;;  %v3526_v27 = vor.u32 %v4213_v7, %v3523_v11  ;;  %v3826_v45 = vor.u32 %v4291_v16, %v3825_v15  ;;  %v3810_v56 = vor.u32 %v4287_v53, %v3809_v52  ;;  %v3857_v15 = vld [vmem:[%s6450_s3 + $0xb0] sm:$0xf]  ;;  %v4299_v16 = vld [vmem:[%s6450_s3 + $0xb4] sm:$0xf0]  ;;  %v4306_v52 = vld [vmem:[%s6450_s3 + $0xf4] sm:$0xf] }
  0xf7   :  { %2043 = vmatpush.bf16.msrb.mxu1 %v3446_v21  ;;  %v3270_v21 = vor.u32 %v4149_v61, %v3267_v2 }
  0xf8   :  { %2057 = vmatpush.bf16.msrb.mxu2 %v3574_v22  ;;  %v1782_v22 = vpop.f32.mrf.mxu2 }
  0xf9   :  { %2071 = vmatpush.bf16.msrb.mxu3 %v3702_v26  ;;  %v3398_v26 = vor.u32 %v4181_v4, %v3395_v5  ;;  %v1783_v10 = vadd.f32 %v1782_v22, %v1769_v1  ;;  %v3858_v22 = vor.u32 %v4299_v16, %v3857_v15  ;;  %v4320_v15 = vld [vmem:[%s6450_s3 + $0x164] sm:$0xf]  ;;  %v3947_v16 = vld [vmem:[%s6450_s3 + $0x168] sm:$0xf0] }
  0xfa   :  { %2030 = vmatpush.bf16.msrb.mxu0 %v3302_v38  ;;  %v4289_v38 = vld [vmem:[%s6450_s3 + $0x64] sm:$0xf0] }
  0xfb   :  { %2044 = vmatpush.bf16.msrb.mxu1 %v3430_v41  ;;  %v1657_v41 = vadd.f32 %v5751_v9, %v1643_v19  ;;  %v1757_v9 = vadd.f32 %v1756_v31, %v306_v57  ;;  %v1797_v2 = vadd.f32 %v1796_v29, %v1783_v10 }
  0xfc   :  { %2058 = vmatpush.bf16.msrb.mxu2 %v3558_v42  ;;  %v1659_v42 = vadd.f32 %v5822_v49, %v1645_v20  ;;  %v3882_v49 = vor.u32 %v4305_v50, %v3881_v48 }
  0xfd   :  { %2072 = vmatpush.bf16.msrb.mxu3 %v3686_v51  ;;  %v3818_v51 = vor.u32 %v4289_v38, %v3817_v35  ;;  %v1671_v54 = vadd.f32 %v5792_v30, %v1657_v41  ;;  %v1771_v57 = vadd.f32 %v1770_v46, %v1757_v9  ;;  %v4279_v38 = vld [vmem:[%s6450_s3 + $0x14] sm:$0xf0] }
  0xfe   :  { %2031 = vmatpush.bf16.msrb.mxu0 %v3286_v59  ;;  %v1673_v55 = vadd.f32 %v5872_v14, %v1659_v42  ;;  %v1798_v14 = vpop.f32.mrf.mxu3  ;;  %v4285_v59 = vld [vmem:[%s6450_s3 + $0x44] sm:$0xf0]  ;;  %v4295_v46 = vld [vmem:[%s6450_s3 + $0x94] sm:$0xf0] }
  0xff   :  { %2045 = vmatpush.bf16.msrb.mxu1 %v3414_v62  ;;  %v1685_v61 = vadd.f32 %v5794_v32, %v1671_v54  ;;  %v3793_v32 = vld [vmem:[%s6450_s3 + $0x30] sm:$0xf]  ;;  %v3891_v54 = vld [vmem:[%s6450_s3 + $0xf8] sm:$0xf0] }
 0x100   :  { %2059 = vmatpush.bf16.msrb.mxu2 %v3542_v63  ;;  %v1784_v30 = vpop.f32.mrf.mxu2  ;;  %v1687_v62 = vadd.f32 %v5874_v18, %v1673_v55  ;;  %v4301_v63 = vld [vmem:[%s6450_s3 + $0xc4] sm:$0xf0]  ;;  %v4283_v18 = vld [vmem:[%s6450_s3 + $0x34] sm:$0xf0]  ;;  %v3833_v55 = vld [vmem:[%s6450_s3 + $0x80] sm:$0xf] }
 0x101   :  { %2073 = vmatpush.bf16.msrb.mxu3 %v3670_v6  ;;  %v1785_v7 = vadd.f32 %v1784_v30, %v1771_v57  ;;  %v1699_v12 = vadd.f32 %v5894_v28, %v1685_v61  ;;  %v3794_v20 = vor.u32 %v4283_v18, %v3793_v32  ;;  %v3785_v28 = vld [vmem:[%s6450_s3 + $0x20] sm:$0xf]  ;;  %v3883_v61 = vld [vmem:[%s6450_s3 + $0xe8] sm:$0xf0] }
 0x102   :  { %2032 = vmatpush.bf16.msrb.mxu0 %v3270_v21  ;;  %v1810_v4 = vpop.f32.mrf.mxu0  ;;  %v1701_v13 = vadd.f32 %v5960_v0, %v1687_v62  ;;  %v4281_v0 = vld [vmem:[%s6450_s3 + $0x24] sm:$0xf0] }
 0x103   :  { %2046 = vmatpush.bf16.msrb.mxu1 %v3398_v26  ;;  %v1824_v6 = vpop.f32.mrf.mxu1  ;;  %v1811_v19 = vadd.f32 %v1810_v4, %v1797_v2  ;;  %v1799_v21 = vadd.f32 %v1798_v14, %v1785_v7  ;;  %v1713_v23 = vadd.f32 %v5902_v33, %v1699_v12  ;;  %v3849_v26 = vld [vmem:[%s6450_s3 + $0xa0] sm:$0xf]  ;;  %v3894_v14 = vor.u32 %v4306_v52, %v3891_v54  ;;  %v4323_v2 = vld [vmem:[%s6450_s3 + $0x174] sm:$0xf0]  ;;  %v3955_v7 = vld [vmem:[%s6450_s3 + $0x178] sm:$0xf0] }
 0x104   :  { %2060 = vmatpush.bf16.msrb.mxu2 %v3526_v27  ;;  %v1715_v24 = vadd.f32 %v5971_v8, %v1701_v13  ;;  %v4297_v27 = vld [vmem:[%s6450_s3 + $0xa4] sm:$0xf0]  ;;  %v3777_v8 = vld [vmem:[%s6450_s3 + $0x10] sm:$0xf] }
 0x105   :  { %2074 = vmatpush.bf16.msrb.mxu3 %v3654_v3  ;;  %2033 = vmatmul.bf16.vlgmr.msrb.gmra.mxu0 %v4881_v39  ;;  %v3873_v39 = vld [vmem:[%s6450_s3 + $0xd0] sm:$0xf]  ;;  %v1825_v29 = vadd.f32 %v1824_v6, %v1811_v19  ;;  %v3850_v33 = vor.u32 %v4297_v27, %v3849_v26  ;;  %v1727_v41 = vadd.f32 %v5941_v17, %v1713_v23  ;;  %v3769_v17 = vld [vmem:[%s6450_s3] sm:$0xf]  ;;  %v4322_v6 = vld [vmem:[%s6450_s3 + $0x174] sm:$0xf] }
 0x106   :  { %2404 = vmatpush.bf16.msra.mxu0 %v3826_v45  ;;  %2047 = vmatmul.bf16.vlgmr.msrb.gmra.mxu1 %v4894_v44  ;;  %v3874_v44 = vor.u32 %v4303_v58, %v3873_v39  ;;  %v1729_v31 = vadd.f32 %v6017_v37, %v1715_v24  ;;  %v3841_v37 = vld [vmem:[%s6450_s3 + $0x90] sm:$0xf]  ;;  %v3778_v1 = vor.u32 %v4279_v38, %v3777_v8  ;;  %v4293_v39 = vld [vmem:[%s6450_s3 + $0x84] sm:$0xf0]  ;;  %v4302_v19 = vld [vmem:[%s6450_s3 + $0xd4] sm:$0xf] }
 0x107   :  { %2418 = vmatpush.bf16.msra.mxu1 %v3890_v34  ;;  %2061 = vmatmul.bf16.vlgmr.msrb.gmra.mxu2 %v4892_v43  ;;  %v3801_v43 = vld [vmem:[%s6450_s3 + $0x40] sm:$0xf]  ;;  %v3786_v34 = vor.u32 %v4281_v0, %v3785_v28  ;;  %v3842_v9 = vor.u32 %v4295_v46, %v3841_v37  ;;  %v1741_v53 = vadd.f32 %v5952_v60, %v1727_v41  ;;  %v4321_v13 = vld [vmem:[%s6450_s3 + $0x164] sm:$0xf0]  ;;  %v4300_v0 = vld [vmem:[%s6450_s3 + $0xc4] sm:$0xf] }
 0x108   :  { %2075 = vmatmul.bf16.vlgmr.msrb.gmra.mxu3 %v4902_v47  ;;  %v3865_v47 = vld [vmem:[%s6450_s3 + $0xc0] sm:$0xf]  ;;  %v3802_v5 = vor.u32 %v4285_v59, %v3801_v43  ;;  %v1743_v50 = vadd.f32 %v6019_v40, %v1729_v31  ;;  %v4304_v59 = vld [vmem:[%s6450_s3 + $0xe4] sm:$0xf]  ;;  %v3958_v12 = vor.u32 %v4322_v6, %v3955_v7  ;;  %v3867_v23 = vld [vmem:[%s6450_s3 + $0xc8] sm:$0xf0] }
 0x109   :  { %v3866_v11 = vor.u32 %v4301_v63, %v3865_v47  ;;  %v2081_v43 = vmax.f32 %v1741_v53, 0.0  ;;  %v3953_v63 = vld [vmem:[%s6450_s3 + $0x170] sm:$0xf]  ;;  %v3886_v18 = vor.u32 %v4304_v59, %v3883_v61  ;;  %v4318_v26 = vld [vmem:[%s6450_s3 + $0x154] sm:$0xf] }
 0x10a   :  { %2405 = vmatpush.bf16.msra.mxu0 %v3818_v51  ;;  %v1838_v25 = vpop.f32.mrf.mxu2  ;;  %v1812_v3 = vpop.f32.mrf.mxu0  ;;  %v2085_v30 = vmax.f32 %v1743_v50, 0.0  ;;  %v3937_v24 = vld [vmem:[%s6450_s3 + $0x150] sm:$0xf]  ;;  %v3859_v31 = vld [vmem:[%s6450_s3 + $0xb8] sm:$0xf0] }
 0x10b   :  { %2419 = vmatpush.bf16.msra.mxu1 %v3882_v49  ;;  %v1852_v45 = vpop.f32.mrf.mxu3  ;;  %v1813_v35 = vadd.f32 %v1812_v3, %v1799_v21  ;;  %v1826_v42 = vpop.f32.mrf.mxu1  ;;  %v1839_v48 = vadd.f32 %v1838_v25, %v1825_v29  ;;  %v4277_v49 = vld [vmem:[%s6450_s3 + $0x4] sm:$0xf0]  ;;  %v4319_v25 = vld [vmem:[%s6450_s3 + $0x154] sm:$0xf0]  ;;  %v3939_v29 = vld [vmem:[%s6450_s3 + $0x158] sm:$0xf0]  ;;  %v3870_v3 = vor.u32 %v4300_v0, %v3867_v23 }
 0x10c   :  { %v3770_v57 = vor.u32 %v4277_v49, %v3769_v17  ;;  %v6205_v4 = vpack.c.bf16 %v2085_v30, %v2081_v43  ;;  %v3938_v27 = vor.u32 %v4319_v25, %v3937_v24  ;;  %v4316_v8 = vld [vmem:[%s6450_s3 + $0x144] sm:$0xf]  ;;  %v3931_v41 = vld [vmem:[%s6450_s3 + $0x148] sm:$0xf0]  ;;  %v3921_v50 = vld [vmem:[%s6450_s3 + $0x130] sm:$0xf] }
 0x10d   :  { %v1827_v51 = vadd.f32 %v1826_v42, %v1813_v35  ;;  %v1853_v58 = vadd.f32 %v1852_v45, %v1839_v48  ;;  %v4298_v45 = vld [vmem:[%s6450_s3 + $0xb4] sm:$0xf]  ;;  %v3929_v35 = vld [vmem:[%s6450_s3 + $0x140] sm:$0xf]  ;;  %v3934_v42 = vor.u32 %v4316_v8, %v3931_v41  ;;  %v4296_v46 = vld [vmem:[%s6450_s3 + $0xa4] sm:$0xf] }
 0x10e   :  { %2406 = vmatpush.bf16.msra.mxu0 %v3810_v56  ;;  %v3862_v37 = vor.u32 %v4298_v45, %v3859_v31  ;;  %v3851_v48 = vld [vmem:[%s6450_s3 + $0xa8] sm:$0xf0]  ;;  %v3923_v17 = vld [vmem:[%s6450_s3 + $0x138] sm:$0xf0]  ;;  %v4294_v53 = vld [vmem:[%s6450_s3 + $0x94] sm:$0xf] }
 0x10f   :  { %2420 = vmatpush.bf16.msra.mxu1 %v3874_v44  ;;  %v3834_v44 = vor.u32 %v4293_v39, %v3833_v55  ;;  %v2082_v62 = vmax.f32 %v1853_v58, 0.0  ;;  %v3854_v49 = vor.u32 %v4296_v46, %v3851_v48  ;;  %v3913_v55 = vld [vmem:[%s6450_s3 + $0x120] sm:$0xf]  ;;  %v4313_v39 = vld [vmem:[%s6450_s3 + $0x124] sm:$0xf0] }
 0x110   :  { %v4312_v58 = vld [vmem:[%s6450_s3 + $0x124] sm:$0xf]  ;;  %v3915_v30 = vld [vmem:[%s6450_s3 + $0x128] sm:$0xf0]  ;;  %v3905_v59 = vld [vmem:[%s6450_s3 + $0x110] sm:$0xf] }
 0x111   :  { %v3835_v43 = vld [vmem:[%s6450_s3 + $0x88] sm:$0xf0]  ;;  %v4311_v61 = vld [vmem:[%s6450_s3 + $0x114] sm:$0xf0] }
 0x112   :  { %2407 = vmatpush.bf16.msra.mxu0 %v3802_v5  ;;  %v1840_v40 = vpop.f32.mrf.mxu2  ;;  %v3954_v5 = vor.u32 %v4323_v2, %v3953_v63  ;;  %v3907_v63 = vld [vmem:[%s6450_s3 + $0x118] sm:$0xf0] }
 0x113   :  { %2421 = vmatpush.bf16.msra.mxu1 %v3866_v11  ;;  %v1841_v10 = vadd.f32 %v1840_v40, %v1827_v51  ;;  %v1854_v56 = vpop.f32.mrf.mxu3  ;;  %v3945_v11 = vld [vmem:[%s6450_s3 + $0x160] sm:$0xf]  ;;  %v4314_v51 = vld [vmem:[%s6450_s3 + $0x134] sm:$0xf]  ;;  %v3843_v40 = vld [vmem:[%s6450_s3 + $0x98] sm:$0xf0] }
 0x114   :  { %2432 = vmatpush.bf16.msra.mxu2 %v3954_v5  ;;  %v3946_v21 = vor.u32 %v4321_v13, %v3945_v11  ;;  %v3926_v52 = vor.u32 %v4314_v51, %v3923_v17  ;;  %v4308_v13 = vld [vmem:[%s6450_s3 + $0x104] sm:$0xf] }
 0x115   :  { %v1855_v60 = vadd.f32 %v1854_v56, %v1841_v10  ;;  %v3914_v56 = vor.u32 %v4313_v39, %v3913_v55 }
 0x116   :  { %2408 = vmatpush.bf16.msra.mxu0 %v3794_v20  ;;  %v3875_v20 = vld [vmem:[%s6450_s3 + $0xd8] sm:$0xf0] }
 0x117   :  { %2422 = vmatpush.bf16.msra.mxu1 %v3858_v22  ;;  %v2086_v47 = vmax.f32 %v1855_v60, 0.0  ;;  %v3950_v22 = vor.u32 %v4320_v15, %v3947_v16  ;;  %v3878_v28 = vor.u32 %v4302_v19, %v3875_v20  ;;  %v3918_v60 = vor.u32 %v4312_v58, %v3915_v30  ;;  %v3899_v16 = vld [vmem:[%s6450_s3 + $0x108] sm:$0xf0]  ;;  %v4288_v58 = vld [vmem:[%s6450_s3 + $0x64] sm:$0xf] }
 0x118   :  { %2433 = vmatpush.bf16.msra.mxu2 %v3946_v21  ;;  %v3902_v20 = vor.u32 %v4308_v13, %v3899_v16 }
 0x119   :  { %v6216_v32 = vpack.c.bf16 %v2086_v47, %v2082_v62  ;;  %v4310_v62 = vld [vmem:[%s6450_s3 + $0x114] sm:$0xf]  ;;  %v3906_v47 = vor.u32 %v4311_v61, %v3905_v59  ;;  %v4284_v59 = vld [vmem:[%s6450_s3 + $0x44] sm:$0xf]  ;;  %v3803_v61 = vld [vmem:[%s6450_s3 + $0x48] sm:$0xf0] }
 0x11a   :  { %2409 = vmatpush.bf16.msra.mxu0 %v3786_v34  ;;  %v3942_v34 = vor.u32 %v4318_v26, %v3939_v29  ;;  %v3910_v5 = vor.u32 %v4310_v62, %v3907_v63  ;;  %v3806_v63 = vor.u32 %v4284_v59, %v3803_v61 }
 0x11b   :  { %2423 = vmatpush.bf16.msra.mxu1 %v3850_v33  ;;  %v4317_v33 = vld [vmem:[%s6450_s3 + $0x144] sm:$0xf0] }
 0x11c   :  { %2434 = vmatpush.bf16.msra.mxu2 %v3938_v27  ;;  %v3930_v38 = vor.u32 %v4317_v33, %v3929_v35 }
 0x11e   :  { %2410 = vmatpush.bf16.msra.mxu0 %v3778_v1  ;;  %v4315_v1 = vld [vmem:[%s6450_s3 + $0x134] sm:$0xf0] }
 0x11f   :  { %2424 = vmatpush.bf16.msra.mxu1 %v3842_v9  ;;  %v3922_v9 = vor.u32 %v4315_v1, %v3921_v50 }
 0x120   :  { %2435 = vmatpush.bf16.msra.mxu2 %v3930_v38 }
 0x122   :  { %2411 = vmatpush.bf16.msra.mxu0 %v3770_v57  ;;  %v1866_v54 = vpop.f32.mrf.mxu0  ;;  %v3846_v57 = vor.u32 %v4294_v53, %v3843_v40  ;;  %v4290_v40 = vld [vmem:[%s6450_s3 + $0x74] sm:$0xf] }
 0x123   :  { %2425 = vmatpush.bf16.msra.mxu1 %v3834_v44  ;;  %v1880_v10 = vpop.f32.mrf.mxu1  ;;  %v4292_v44 = vld [vmem:[%s6450_s3 + $0x84] sm:$0xf] }
 0x124   :  { %2436 = vmatpush.bf16.msra.mxu2 %v3922_v9  ;;  %v3838_v2 = vor.u32 %v4292_v44, %v3835_v43 }
 0x125   :  { %2412 = vmatmul.bf16.vlgmr.msra.gmra.mxu0 %v6205_v4 }
 0x126   :  { %2474 = vmatpush.bf16.msrb.mxu0 %v3894_v14  ;;  %2426 = vmatmul.bf16.vlgmr.msra.gmra.mxu1 %v6216_v32  ;;  %v307_v14 = vperm.slane %v6015_v36, 2 }
 0x127   :  { %2488 = vmatpush.bf16.msrb.mxu1 %v3958_v12  ;;  %v4309_v12 = vld [vmem:[%s6450_s3 + $0x104] sm:$0xf0] }
 0x128   :  { %2437 = vmatpush.bf16.msra.mxu2 %v3914_v56  ;;  %v1867_v7 = vadd.f32 %v1866_v54, %v307_v14  ;;  %v3827_v54 = vld [vmem:[%s6450_s3 + $0x78] sm:$0xf0] }
 0x129   :  { %v3830_v39 = vor.u32 %v4290_v40, %v3827_v54  ;;  %v4331_v54 = vld [vmem:[%s6452_s5 + $0x38] sm:$0xff] }
 0x12a   :  { %2475 = vmatpush.bf16.msrb.mxu0 %v3886_v18  ;;  %v1894_v6 = vpop.f32.mrf.mxu2  ;;  %v3897_v18 = vld [vmem:[%s6450_s3 + $0x100] sm:$0xf]  ;;  %v1868_v19 = vpop.f32.mrf.mxu0 }
 0x12b   :  { %2489 = vmatpush.bf16.msrb.mxu1 %v3950_v22  ;;  %v1908_v11 = vpop.f32.mrf.mxu3  ;;  %v3898_v15 = vor.u32 %v4309_v12, %v3897_v18  ;;  %v1882_v21 = vpop.f32.mrf.mxu1  ;;  %v1881_v22 = vadd.f32 %v1880_v10, %v1867_v7  ;;  %v3819_v10 = vld [vmem:[%s6450_s3 + $0x68] sm:$0xf0]  ;;  %v4282_v7 = vld [vmem:[%s6450_s3 + $0x34] sm:$0xf] }
 0x12c   :  { %2438 = vmatpush.bf16.msra.mxu2 %v3906_v47  ;;  %v3822_v56 = vor.u32 %v4288_v58, %v3819_v10  ;;  %v308_v47 = vperm.slane %v6015_v36, 3  ;;  %v4280_v36 = vld [vmem:[%s6450_s3 + $0x24] sm:$0xf]  ;;  %v4326_v10 = vld [vmem:[%s6452_s5 + $0x10] sm:$0xff] }
 0x12d   :  { %v1895_v0 = vadd.f32 %v1894_v6, %v1881_v22  ;;  %v4328_v58 = vld [vmem:[%s6452_s5 + $0x20] sm:$0xff] }
 0x12e   :  { %2476 = vmatpush.bf16.msrb.mxu0 %v3878_v28  ;;  %v1869_v28 = vadd.f32 %v1868_v19, %v307_v14 }
 0x12f   :  { %2490 = vmatpush.bf16.msrb.mxu1 %v3942_v34  ;;  %v1909_v26 = vadd.f32 %v1908_v11, %v1895_v0  ;;  %v3795_v11 = vld [vmem:[%s6450_s3 + $0x38] sm:$0xf0] }
 0x130   :  { %2439 = vmatpush.bf16.msra.mxu2 %v3898_v15  ;;  %v1883_v24 = vadd.f32 %v1882_v21, %v1869_v28  ;;  %v3798_v13 = vor.u32 %v4282_v7, %v3795_v11  ;;  %v3787_v15 = vld [vmem:[%s6450_s3 + $0x28] sm:$0xf0]  ;;  %v4278_v28 = vld [vmem:[%s6450_s3 + $0x14] sm:$0xf]  ;;  %v3779_v0 = vld [vmem:[%s6450_s3 + $0x18] sm:$0xf0] }
 0x131   :  { %v3790_v16 = vor.u32 %v4280_v36, %v3787_v15 }
 0x132   :  { %2477 = vmatpush.bf16.msrb.mxu0 %v3870_v3  ;;  %v1896_v23 = vpop.f32.mrf.mxu2 }
 0x133   :  { %2491 = vmatpush.bf16.msrb.mxu1 %v3934_v42  ;;  %v1910_v25 = vpop.f32.mrf.mxu3  ;;  %v1897_v3 = vadd.f32 %v1896_v23, %v1883_v24 }
 0x135   :  { %v1911_v31 = vadd.f32 %v1910_v25, %v1897_v3  ;;  %v3771_v3 = vld [vmem:[%s6450_s3 + $0x8] sm:$0xf0] }
 0x136   :  { %2478 = vmatpush.bf16.msrb.mxu0 %v3862_v37 }
 0x137   :  { %2492 = vmatpush.bf16.msrb.mxu1 %v3926_v52 }
 0x13a   :  { %2479 = vmatpush.bf16.msrb.mxu0 %v3854_v49  ;;  %v2141_v49 = vld [vmem:[%s6450_s3 + $0x180] sm:$0xff] }
 0x13b   :  { %2493 = vmatpush.bf16.msrb.mxu1 %v3918_v60  ;;  %v2293_v52 = vunpack.c.l.b16 %v2141_v49  ;;  %v3811_v60 = vld [vmem:[%s6450_s3 + $0x58] sm:$0xf0]  ;;  %v2294_v43 = vunpack.c.h.b16 %v2141_v49 }
 0x13d   :  { %v2343_v53 = vpack.c.b16 %v2293_v52, %v2293_v52  ;;  %v2344_v62 = vpack.c.b16 %v2294_v43, %v2294_v43 }
 0x13e   :  { %2480 = vmatpush.bf16.msrb.mxu0 %v3846_v57  ;;  %v4286_v57 = vld [vmem:[%s6450_s3 + $0x54] sm:$0xf] }
 0x13f   :  { %2494 = vmatpush.bf16.msrb.mxu1 %v3910_v5  ;;  %v2399_v55 = vsel %vm2397_vm0, %v2343_v53, 0  ;;  %v3814_v14 = vor.u32 %v4286_v57, %v3811_v60  ;;  %v2402_v5 = vsel %vm2397_vm0, %v2344_v62, 0  ;;  %v2142_v60 = vld [vmem:[%s6453_s4] sm:$0x3] }
 0x140   :  { %2453 = vmatpush.bf16.msra.mxu3 %v2399_v55  ;;  %2509 = vmatpush.bf16.msrb.mxu2 %v2402_v5  ;;  %v4330_v55 = vld [vmem:[%s6452_s5 + $0x30] sm:$0xff]  ;;  %v2144_v59 = vperm.slane %v2142_v60, 0 }
 0x142   :  { %2481 = vmatpush.bf16.msrb.mxu0 %v3838_v2  ;;  %v1922_v27 = vpop.f32.mrf.mxu0 }
 0x143   :  { %2495 = vmatpush.bf16.msrb.mxu1 %v3902_v20  ;;  %v1936_v29 = vpop.f32.mrf.mxu1  ;;  %v1923_v45 = vadd.f32 %v1922_v27, %v1909_v26  ;;  %v3782_v27 = vor.u32 %v4278_v28, %v3779_v0 }
 0x144   :  { %2460 = vmatpush.bf16.msrb.mxu3 %v3830_v39  ;;  %v4329_v39 = vld [vmem:[%s6452_s5 + $0x28] sm:$0xff] }
 0x145   :  { %2482 = vmatmul.bf16.vlgmr.msrb.gmra.mxu0 %v6216_v32  ;;  %v1937_v35 = vadd.f32 %v1936_v29, %v1923_v45  ;;  %v4276_v29 = vld [vmem:[%s6450_s3 + $0x4] sm:$0xf] }
 0x146   :  { %v3774_v45 = vor.u32 %v4276_v29, %v3771_v3 }
 0x148   :  { %2461 = vmatpush.bf16.msrb.mxu3 %v3822_v56  ;;  %v4325_v56 = vld [vmem:[%s6452_s5 + $0x8] sm:$0xff] }
 0x14a   :  { %v1950_v34 = vpop.f32.mrf.mxu2  ;;  %v1924_v33 = vpop.f32.mrf.mxu0 }
 0x14b   :  { %v1964_v8 = vpop.f32.mrf.mxu3  ;;  %v1925_v38 = vadd.f32 %v1924_v33, %v1911_v31  ;;  %v1938_v41 = vpop.f32.mrf.mxu1  ;;  %v1951_v42 = vadd.f32 %v1950_v34, %v1937_v35 }
 0x14c   :  { %2462 = vmatpush.bf16.msrb.mxu3 %v3814_v14 }
 0x14d   :  { %v1939_v37 = vadd.f32 %v1938_v41, %v1925_v38  ;;  %v1965_v46 = vadd.f32 %v1964_v8, %v1951_v42 }
 0x14f   :  { %v2083_v51 = vmax.f32 %v1965_v46, 0.0 }
 0x150   :  { %2463 = vmatpush.bf16.msrb.mxu3 %v3806_v63 }
 0x152   :  { %v1952_v32 = vpop.f32.mrf.mxu2 }
 0x153   :  { %v1953_v48 = vadd.f32 %v1952_v32, %v1939_v37  ;;  %v1966_v50 = vpop.f32.mrf.mxu3 }
 0x154   :  { %2464 = vmatpush.bf16.msrb.mxu3 %v3798_v13 }
 0x155   :  { %v1967_v1 = vadd.f32 %v1966_v50, %v1953_v48 }
 0x157   :  { %v2087_v9 = vmax.f32 %v1967_v1, 0.0 }
 0x158   :  { %2465 = vmatpush.bf16.msrb.mxu3 %v3790_v16 }
 0x159   :  { %v2091_v17 = vpack.c.bf16 %v2087_v9, %v2083_v51 }
 0x15b   :  { %2440 = vmatmul.bf16.vlgmr.msra.gmra.mxu2 %v2091_v17  ;;  %2496 = vmatmul.bf16.vlgmr.msrb.gmra.mxu1 %v2091_v17 }
 0x15c   :  { %2466 = vmatpush.bf16.msrb.mxu3 %v3782_v27  ;;  %2602 = vmatpush.bf16.msra.mxu2 %v4331_v54  ;;  %v4334_v54 = vld [vmem:[%s6456_s9] sm:$0xff] }
 0x160   :  { %2467 = vmatpush.bf16.msrb.mxu3 %v3774_v45  ;;  %2603 = vmatpush.bf16.msra.mxu2 %v4330_v55 }
 0x162   :  { %v1978_v30 = vpop.f32.mrf.mxu0 }
 0x163   :  { %v1992_v44 = vpop.f32.mrf.mxu1  ;;  %v1979_v18 = vadd.f32 %v1978_v30, %v308_v47  ;;  %v4324_v30 = vld [vmem:[%s6452_s5] sm:$0xff] }
 0x164   :  { %2604 = vmatpush.bf16.msra.mxu2 %v4329_v39  ;;  %v4342_v39 = vld [vmem:[%s6454_s8] ss:$0 sm:$0xff] }
 0x165   :  { %v1993_v20 = vadd.f32 %v1992_v44, %v1979_v18  ;;  %v4332_v44 = vld [vmem:[%s6452_s5 + $0x40] sm:$0xff] }
 0x168   :  { %2605 = vmatpush.bf16.msra.mxu2 %v4328_v58 }
 0x16a   :  { %v2006_v2 = vpop.f32.mrf.mxu2  ;;  %v1980_v12 = vpop.f32.mrf.mxu0 }
 0x16b   :  { %v2020_v6 = vpop.f32.mrf.mxu3  ;;  %v1994_v19 = vpop.f32.mrf.mxu1  ;;  %v1981_v21 = vadd.f32 %v1980_v12, %v308_v47  ;;  %v2007_v23 = vadd.f32 %v2006_v2, %v1993_v20  ;;  %v2145_v20 = vperm.slane %v2142_v60, 1 }
 0x16d   :  { %v1995_v24 = vadd.f32 %v1994_v19, %v1981_v21  ;;  %v2021_v34 = vadd.f32 %v2020_v6, %v2007_v23 }
 0x172   :  { %v2008_v22 = vpop.f32.mrf.mxu2 }
 0x173   :  { %v2022_v25 = vpop.f32.mrf.mxu3  ;;  %v2009_v35 = vadd.f32 %v2008_v22, %v1995_v24 }
 0x175   :  { %v2023_v38 = vadd.f32 %v2022_v25, %v2009_v35 }
 0x182   :  { %v2034_v26 = vpop.f32.mrf.mxu0 }
 0x183   :  { %v2048_v31 = vpop.f32.mrf.mxu1  ;;  %v2035_v33 = vadd.f32 %v2034_v26, %v2021_v34 }
 0x185   :  { %v2049_v37 = vadd.f32 %v2048_v31, %v2035_v33 }
 0x18a   :  { %v2062_v8 = vpop.f32.mrf.mxu2  ;;  %v2036_v42 = vpop.f32.mrf.mxu0 }
 0x18b   :  { %v2076_v41 = vpop.f32.mrf.mxu3  ;;  %v2037_v32 = vadd.f32 %v2036_v42, %v2023_v38  ;;  %v2063_v46 = vadd.f32 %v2062_v8, %v2049_v37  ;;  %v2050_v48 = vpop.f32.mrf.mxu1  ;;  %v4333_v42 = vld [vmem:[%s6455_s7] sm:$0xff]  ;;  %v4335_v37 = vld [vmem:[%s6456_s9 + $0x8] sm:$0xff] }
 0x18c   :  { %2655 = vmatpush.bf16.msra.mxu0 %v4333_v42  ;;  %2695 = vmatpush.bf16.msra.mxu1 %v4335_v37 }
 0x18d   :  { %v2051_v50 = vadd.f32 %v2050_v48, %v2037_v32  ;;  %v2077_v51 = vadd.f32 %v2076_v41, %v2063_v46  ;;  %v4341_v48 = vld [vmem:[%s6451_s6] ss:$0 sm:$0xff] }
 0x18f   :  { %v2084_v52 = vmax.f32 %v2077_v51, 0.0 }
 0x190   :  { %2696 = vmatpush.bf16.msra.mxu1 %v4334_v54 }
 0x192   :  { %v2064_v1 = vpop.f32.mrf.mxu2 }
 0x193   :  { %v2065_v9 = vadd.f32 %v2064_v1, %v2051_v50  ;;  %v2078_v17 = vpop.f32.mrf.mxu3 }
 0x195   :  { %v2079_v49 = vadd.f32 %v2078_v17, %v2065_v9 }
 0x197   :  { %v2088_v53 = vmax.f32 %v2079_v49, 0.0 }
 0x199   :  { %v2092_v40 = vpack.c.bf16 %v2088_v53, %v2084_v52 }
 0x19b   :  { %3959 = vmatmul.msk.bf16.vlgmr.msra.gmra.mxu3 %vm2393_vm1, %v2092_v40  ;;  %3960 = vmatmul.msk.bf16.vlgmr.msrb.gmra.mxu2 %vm2393_vm1, %v2092_v40 }
 0x19c   :  { %2623 = vmatpush.bf16.msra.mxu3 %v4332_v44 }
 0x1a2   :  { %v2413_v57 = vpop.f32.mrf.mxu0 }
 0x1a3   :  { %v2427_v14 = vpop.f32.mrf.mxu1  ;;  %v2414_v62 = vadd.f32 %v2413_v57, %v2144_v59 }
 0x1a5   :  { %v2428_v5 = vadd.f32 %v2427_v14, %v2414_v62  ;;  %v4343_v14 = vld [vmem:[%s6457_s10] ss:$0 sm:$0xff] }
 0x1aa   :  { %v2415_v61 = vpop.f32.mrf.mxu0 }
 0x1ab   :  { %2468 = vmatmul.bf16.vlgmr.msrb.gmra.mxu3 %v6205_v4  ;;  %v4327_v4 = vld [vmem:[%s6452_s5 + $0x18] sm:$0xff]  ;;  %v2416_v63 = vadd.f32 %v2415_v61, %v2144_v59  ;;  %v2429_v2 = vpop.f32.mrf.mxu1 }
 0x1ac   :  { %2606 = vmatpush.bf16.msra.mxu2 %v4327_v4 }
 0x1ad   :  { %v2430_v7 = vadd.f32 %v2429_v2, %v2416_v63 }
 0x1b0   :  { %2607 = vmatpush.bf16.msra.mxu2 %v4326_v10 }
 0x1b4   :  { %2608 = vmatpush.bf16.msra.mxu2 %v4325_v56 }
 0x1b8   :  { %2609 = vmatpush.bf16.msra.mxu2 %v4324_v30 }
 0x1c2   :  { %v2483_v21 = vpop.f32.mrf.mxu0 }
 0x1ca   :  { %v2485_v29 = vpop.f32.mrf.mxu0 }
 0x1d8   :  { %v2497_v0 = vpop.f32.mrf.mxu1 }
 0x1de   :  { %v2441_v43 = vpop.f32.mrf.mxu2 }
 0x1df   :  { %v2442_v11 = vadd.f32 %v2441_v43, %v2428_v5 }
 0x1e0   :  { %v2499_v45 = vpop.f32.mrf.mxu1 }
 0x1e6   :  { %v2443_v6 = vpop.f32.mrf.mxu2 }
 0x1e7   :  { %v2444_v18 = vadd.f32 %v2443_v6, %v2430_v7 }
 0x21e   :  { %v2455_v47 = vpop.f32.mrf.mxu3  ;;  %v2511_v23 = vpop.f32.mrf.mxu2 }
 0x21f   :  { %v2456_v12 = vadd.f32 %v2455_v47, %v2442_v11 }
 0x221   :  { %v2516_v15 = vmax.f32 %v2456_v12, 0.0 }
 0x226   :  { %v2457_v13 = vpop.f32.mrf.mxu3  ;;  %v2513_v35 = vpop.f32.mrf.mxu2 }
 0x227   :  { %v2458_v36 = vadd.f32 %v2457_v13, %v2444_v18 }
 0x229   :  { %v2518_v16 = vmax.f32 %v2458_v36, 0.0 }
 0x22b   :  { %v2520_v19 = vpack.c.bf16 %v2518_v16, %v2516_v15 }
 0x22d   :  { %2610 = vmatmul.bf16.vlgmr.msra.gmra.mxu2 %v2520_v19 }
 0x22e   :  { %v2469_v22 = vpop.f32.mrf.mxu3 }
 0x22f   :  { %v2470_v28 = vadd.f32 %v2469_v22, %v2145_v20 }
 0x231   :  { %v2484_v24 = vadd.f32 %v2483_v21, %v2470_v28 }
 0x233   :  { %v2498_v26 = vadd.f32 %v2497_v0, %v2484_v24 }
 0x235   :  { %v2512_v31 = vadd.f32 %v2511_v23, %v2498_v26 }
 0x236   :  { %v2471_v25 = vpop.f32.mrf.mxu3 }
 0x237   :  { %v2472_v27 = vadd.f32 %v2471_v25, %v2145_v20  ;;  %v2517_v8 = vmax.f32 %v2512_v31, 0.0 }
 0x239   :  { %v2486_v3 = vadd.f32 %v2485_v29, %v2472_v27 }
 0x23b   :  { %v2500_v34 = vadd.f32 %v2499_v45, %v2486_v3 }
 0x23d   :  { %v2514_v33 = vadd.f32 %v2513_v35, %v2500_v34 }
 0x23f   :  { %v2519_v38 = vmax.f32 %v2514_v33, 0.0 }
 0x241   :  { %v2521_v41 = vpack.c.bf16 %v2519_v38, %v2517_v8 }
 0x243   :  { %3997 = vmatmul.msk.bf16.vlgmr.msra.gmra.mxu3 %vm2598_vm2, %v2521_v41 }
 0x2b0   :  { %v2611_v32 = vpop.f32.mrf.mxu2 }
 0x2b1   :  { %v2612_v1 = vadd.f32 %v4341_v48, %v2611_v32 }
 0x2b8   :  { %v2613_v50 = vpop.f32.mrf.mxu2 }
 0x2b9   :  { %v2614_v51 = vadd.f32 %v4341_v48, %v2613_v50 }
 0x2c6   :  { %v2625_v46 = vpop.f32.mrf.mxu3 }
 0x2c7   :  { %v2626_v9 = vadd.f32 %v2625_v46, %v2612_v1 }
 0x2c9   :  { %v2630_v52 = vmax.f32 %v2626_v9, 0.0 }
 0x2ce   :  { %v2627_v17 = vpop.f32.mrf.mxu3 }
 0x2cf   :  { %v2628_v49 = vadd.f32 %v2627_v17, %v2614_v51 }
 0x2d1   :  { %v2631_v53 = vmax.f32 %v2628_v49, 0.0 }
 0x2d3   :  { %v2632_v40 = vpack.c.bf16 %v2631_v53, %v2630_v52 }
 0x2d5   :  { %4002 = vmatmul.msk.bf16.vlgmr.msra.gmra.mxu0 %vm2598_vm2, %v2632_v40 }
 0x352   :  { %v2657_v55 = vpop.f32.mrf.mxu0 }
 0x353   :  { %v2658_v58 = vadd.f32 %v4342_v39, %v2657_v55 }
 0x355   :  { %v2662_v56 = vmax.f32 %v2658_v58, 0.0 }
 0x35a   :  { %v2659_v4 = vpop.f32.mrf.mxu0 }
 0x35b   :  { %v2660_v10 = vadd.f32 %v4342_v39, %v2659_v4 }
 0x35d   :  { %v2663_v30 = vmax.f32 %v2660_v10, 0.0 }
 0x35f   :  { %v2664_v57 = vpack.c.bf16 %v2663_v30, %v2662_v56 }
 0x361   :  { %4011 = vmatmul.msk.bf16.vlgmr.msra.gmra.mxu1 %vm2685_vm3, %v2664_v57 }
 0x3de   :  { %v2698_v60 = vpop.f32.mrf.mxu1 }
 0x3df   :  { %v2699_v43 = vadd.f32 %v4343_v14, %v2698_v60 }
 0x3e6   :  { %v2700_v44 = vpop.f32.mrf.mxu1 }
 0x3e7   :  { %v2701_v59 = vadd.f32 %v4343_v14, %v2700_v44 }
 0x3e9   :  { %v4339_v61 = vpack.c.bf16 %v2701_v59, %v2699_v43 }
 0x3eb   :  { %4340 = vst [vmem:[%s6458_s11] sm:$0xff] %v4339_v61  }

</bundles_post_ra>
